<compile_context>
chip_gen: v7x
topology: tpu7x:2x2x1
jax: 0.10.0
libtpu: 0.0.40
codegen_flags: <defaults>
</compile_context>

<pallas_src>
import functools

import jax
import jax.numpy as jnp
from jax.experimental import pallas as pl
from jax.experimental.pallas import tpu as pltpu

_MIB = 1024 * 1024


def attention_kernel(enc_ref,    # VMEM [TB, S, 2H]   (f32 or bf16)
                     dec_ref,    # VMEM [TB, E]       (f32 or bf16)
                     lens_ref,   # VMEM [TB, 1] int32
                     wenc_ref,   # VMEM [2H, H]       (f32 or bf16)
                     wdec_ref,   # VMEM [E, H]        (f32 or bf16)
                     b1_ref,     # VMEM [1, H]  f32
                     vw_ref,     # VMEM [1, H]  f32
                     vb_ref,     # SMEM [1, 1]  f32
                     out_ref,    # VMEM [TB, S] or [1, TB*S]  f32
                     *, lane_dense_out):
    tb, s, h2 = enc_ref.shape
    h = wenc_ref.shape[-1]

    # (1) Encoder projection: one lane/sublane-dense MXU matmul over all TB*S
    #     rows.  (For H < 256 this only half-fills v6e/v7x's 256-wide MXU; the
    #     kernel is HBM/EUP-bound there, so effort goes to bf16 operands and a
    #     bigger TB rather than matmul restructuring.)
    enc2d = enc_ref[...].reshape(tb * s, h2)               # layout no-op (S % tile == 0)
    pre = jnp.dot(enc2d, wenc_ref[...],
                  preferred_element_type=jnp.float32)      # [TB*S, H] f32

    # (2) Decoder projection: single [TB, E] x [E, H] matmul, broadcast over S.
    dproj = jnp.dot(dec_ref[...], wdec_ref[...],
                    preferred_element_type=jnp.float32)
    dproj = dproj + b1_ref[...]                            # [TB, H] f32

    # EUP tanh kept in f32 (bf16 tanh ~2x EUP throughput on v6e/v7x, but only
    # worth it if the bundle shows the EUP slot saturating; v5e has no bf16 EUP).
    x = jnp.tanh(pre.reshape(tb, s, h) + dproj[:, None, :])    # [TB, S, H] f32

    # (3) v-contraction: VPU multiply + cross-lane (XLU) reduce over H; the MXU
    #     stays free and S stays on lanes for the output store.  For large
    #     production H, re-check the bundle: the lane-reduce + relayout can bind
    #     on v6e/v7x's 2 XLUs (small H here -> noise).
    score = jnp.sum(x * vw_ref[...], axis=-1) + vb_ref[0, 0]   # [TB, S]

    # (4) Length mask + numerically-stable softmax.  -1e30 (not -inf): exp
    #     underflows to exactly 0 for masked positions and a zero-length row
    #     stays finite (uniform) instead of NaN -- deliberate deviation from the
    #     PyTorch reference for the degenerate length-0 case.
    idx = jax.lax.broadcasted_iota(jnp.int32, (tb, s), 1)
    masked = jnp.where(idx >= lens_ref[...], jnp.float32(-1e30), score)
    m = jnp.max(masked, axis=-1, keepdims=True)
    e = jnp.exp(masked - m)
    denom = jnp.sum(e, axis=-1, keepdims=True)
    attn = e * pl.reciprocal(denom)                        # exact recip + multiply

    if lane_dense_out:
        # [TB, S<128] would lower to masked vst.msk partial stores; present one
        # lane-dense [1, TB*S] row instead (one XLU relayout vs masked stores).
        out_ref[...] = attn.reshape(1, tb * s)
    else:
        out_ref[...] = attn


def _device_vmem_and_cores():
    """Best-effort per-TensorCore VMEM capacity and TensorCores per chip."""
    vmem_cap = 128 * _MIB
    try:
        vmem_cap = int(pltpu.get_tpu_info().vmem_capacity_bytes)
    except Exception:
        pass
    kind = ""
    try:
        kind = (jax.devices()[0].device_kind or "").lower()
    except Exception:
        pass
    # v7x: 64 MiB VMEM per TC, 2 TCs per chip; v5e/v6e: 128 MiB, 1 TC.
    num_tc = 2 if ("v7" in kind or vmem_cap <= 64 * _MIB) else 1
    return vmem_cap, num_tc


def _pick_tb(B, S, H2, E, H, enc_bytes, vmem_limit, num_tc):
    """VMEM-aware batch-tile selection (replaces the fixed 256..8 ladder)."""
    # Steady-state per-batch-row VMEM bytes: double-buffered enc/dec/len/out
    # tiles plus the f32 intermediates (pre, x, softmax temps) live in one step.
    per_row = (2 * S * H2 * enc_bytes      # enc tile (double-buffered)
               + 2 * E * enc_bytes         # dec tile
               + 2 * 4                     # lengths
               + 2 * S * 4                 # out tile
               + 2 * S * H * 4             # pre + x (f32)
               + 6 * S * 4)                # score / exp / softmax temporaries
    # Loop-invariant weights (single-buffered) + slack for compiler scratch.
    fixed = (H2 * H + E * H + 2 * H) * enc_bytes + 512 * 1024
    budget = int(vmem_limit * 0.75) - fixed

    # Sublane-dense candidates: multiples of 8 dividing B, plus B itself
    # (a single grid step is fine on v5e/v6e -- the grid is a sequential loop).
    cands = sorted({c for c in range(8, B + 1, 8) if B % c == 0} | {B})
    tb = cands[0]
    for c in cands:
        if c * per_row <= budget:
            tb = c

    # v7x megacore: keep >=2 parallel grid steps, but only when each half is
    # big enough to dwarf the ~0.35 us per-step overhead (>= ~1 MiB enc tile).
    if num_tc >= 2 and B // tb < 2:
        halves = [c for c in cands if c <= tb // 2]
        if halves and halves[-1] * S * H2 * enc_bytes >= _MIB:
            tb = halves[-1]
    return tb


def attention_forward(dec_input, enc_output, text_lengths, params,
                      *, tb=None, use_bf16_matmul=True):
    B, S, H2 = enc_output.shape
    E = dec_input.shape[-1]
    H = params["w_enc"].shape[1]

    # Reshape no-op guards: the in-kernel [TB,S,2H]->[TB*S,2H] and
    # [TB*S,H]->[TB,S,H] reshapes are layout no-ops only when S is a multiple of
    # the sublane tile (8 for f32, 16 for bf16); otherwise they'd silently
    # materialize VMEM relayout copies of the largest intermediates every step.
    assert S % 8 == 0, f"S={S} must be a multiple of 8"
    if use_bf16_matmul and S % 16 != 0:
        use_bf16_matmul = False   # avoid silent bf16 relayouts

    vmem_cap, num_tc = _device_vmem_and_cores()
    # Generation-aware scoped-VMEM limit: ~56 MiB on v7x (64 MiB physical),
    # ~100 MiB on v5e/v6e (128 MiB physical) so larger batch tiles double-buffer.
    vmem_limit = 56 * _MIB if vmem_cap <= 64 * _MIB else 100 * _MIB

    enc_in, dec_in = enc_output, dec_input.reshape(B, E)
    w_enc, w_dec = params["w_enc"], params["w_dec"]
    if use_bf16_matmul:
        # MXU operands only (accumulation stays f32 via preferred_element_type);
        # halves the dominant enc HBM->VMEM traffic and unlocks the bf16 MXU rate.
        enc_in, dec_in = enc_in.astype(jnp.bfloat16), dec_in.astype(jnp.bfloat16)
        w_enc, w_dec = w_enc.astype(jnp.bfloat16), w_dec.astype(jnp.bfloat16)
    enc_bytes = enc_in.dtype.itemsize

    if tb is None:
        tb = _pick_tb(B, S, H2, E, H, enc_bytes, vmem_limit, num_tc)
    assert B % tb == 0, (B, tb)
    n_blocks = B // tb

    lens2d = text_lengths.astype(jnp.int32).reshape(B, 1)

    # Lane-dense output path for S < 128 (see kernel comment).
    lane_dense = (S < 128) and ((tb * S) % 128 == 0)

    def call(single_buffer_weights, lane_dense_out):
        # Loop-invariant weights: constant index_map -> never re-DMA'd, so a
        # second pipeline buffer is pure waste; single-buffer them.
        wkw = {"pipeline_mode": pl.Buffered(1)} if single_buffer_weights else {}
        in_specs = [
            pl.BlockSpec((tb, S, H2), lambda i: (i, 0, 0)),       # enc_output
            pl.BlockSpec((tb, E), lambda i: (i, 0)),              # dec_input
            pl.BlockSpec((tb, 1), lambda i: (i, 0)),              # text_lengths
            pl.BlockSpec((H2, H), lambda i: (0, 0), **wkw),       # W_enc
            pl.BlockSpec((E, H), lambda i: (0, 0), **wkw),        # W_dec
            pl.BlockSpec((1, H), lambda i: (0, 0), **wkw),        # attn bias
            pl.BlockSpec((1, H), lambda i: (0, 0), **wkw),        # v weight row
            pl.BlockSpec(memory_space=pltpu.MemorySpace.SMEM),    # v bias scalar
        ]
        if lane_dense_out:
            out_specs = pl.BlockSpec((1, tb * S), lambda i: (i, 0))
            out_shape = jax.ShapeDtypeStruct((n_blocks, tb * S), jnp.float32)
        else:
            out_specs = pl.BlockSpec((tb, S), lambda i: (i, 0))
            out_shape = jax.ShapeDtypeStruct((B, S), jnp.float32)
        grid_spec = pltpu.PrefetchScalarGridSpec(
            num_scalar_prefetch=0,
            grid=(n_blocks,),
            in_specs=in_specs,
            out_specs=out_specs,
        )
        return pl.pallas_call(
            functools.partial(attention_kernel, lane_dense_out=lane_dense_out),
            out_shape=out_shape,
            grid_spec=grid_spec,
            compiler_params=pltpu.CompilerParams(
                dimension_semantics=("parallel",),   # batch axis: megacore on v7x
                vmem_limit_bytes=vmem_limit,
            ),
        )(enc_in, dec_in, lens2d, w_enc, w_dec,
          params["b1"], params["v_w"], params["v_b"])

    # Prefer the optimized configuration (single-buffered weights + lane-dense
    # store); fall back to the plain configuration if this JAX build rejects it.
    try:
        out = call(True, lane_dense)
    except Exception:
        out = call(False, False)
    return out.reshape(B, S)


def reference(dec_input, enc_output, text_lengths, params):
    """Pure-JAX mirror of the PyTorch forward for verification."""
    B, S, _ = enc_output.shape
    E = dec_input.shape[-1]
    dec_rep = jnp.broadcast_to(dec_input, (B, S, E))
    cat = jnp.concatenate([enc_output, dec_rep], axis=2)
    W = jnp.concatenate([params["w_enc"], params["w_dec"]], axis=0)
    x = jnp.tanh(cat @ W + params["b1"][0])
    att = jnp.einsum("bsh,h->bs", x, params["v_w"][0]) + params["v_b"][0, 0]
    mask = jnp.arange(S)[None, :] >= text_lengths[:, None]
    att = jnp.where(mask, -jnp.inf, att)
    return jax.nn.softmax(att, axis=-1)


def init_params(key, emb_size, hidden_size):
    """Deterministic init matching the shapes of the PyTorch module."""
    in_attn = hidden_size * 2 + emb_size
    k_attn = 1.0 / jnp.sqrt(jnp.float32(in_attn))
    k_v = 1.0 / jnp.sqrt(jnp.float32(hidden_size))
    k1, k2, k3, k4 = jax.random.split(key, 4)
    # attn: Linear(2H+E -> H), stored transposed ([in, out]) and split.
    W_full = jax.random.uniform(k1, (in_attn, hidden_size),
                                minval=-k_attn, maxval=k_attn, dtype=jnp.float32)
    b1 = jax.random.uniform(k2, (1, hidden_size),
                            minval=-k_attn, maxval=k_attn, dtype=jnp.float32)
    # v: Linear(H -> 1), stored as a [1, H] row + [1, 1] bias.
    v_w = jax.random.uniform(k3, (1, hidden_size),
                             minval=-k_v, maxval=k_v, dtype=jnp.float32)
    v_b = jax.random.uniform(k4, (1, 1),
                             minval=-k_v, maxval=k_v, dtype=jnp.float32)
    return {
        "w_enc": W_full[: hidden_size * 2, :],   # multiplies enc_output
        "w_dec": W_full[hidden_size * 2:, :],    # multiplies repeated dec_input
        "b1": b1,
        "v_w": v_w,
        "v_b": v_b,
    }


if __name__ == "__main__":
    B, S, E, H = 16, 16, 32, 32

    key = jax.random.PRNGKey(0)
    k_dec, k_enc, k_par = jax.random.split(key, 3)

    dec_input = jax.random.normal(k_dec, (B, 1, E), dtype=jnp.float32)
    enc_output = jax.random.normal(k_enc, (B, S, 2 * H), dtype=jnp.float32)
    text_lengths = jnp.array([5, 16, 1, 9, 16, 3, 12, 7,
                              16, 2, 8, 15, 4, 11, 6, 10], dtype=jnp.int32)

    params = init_params(k_par, E, H)
    ref = reference(dec_input, enc_output, text_lengths, params)

    # f32 MXU operands: strict correctness check against the pure-JAX reference.
    out = attention_forward(dec_input, enc_output, text_lengths, params,
                            use_bf16_matmul=False)
    out = jax.block_until_ready(out)
    assert out.shape == (B, S)
    assert jnp.allclose(out, ref, rtol=2e-5, atol=2e-6)
    # masked positions must be exactly zero after softmax (text_lengths[0] == 5)
    assert jnp.all(out[0, 5:] == 0.0)
    # rows must sum to 1
    assert bool(jnp.all(jnp.abs(out.sum(-1) - 1.0) < 1e-5))

    # Default path (bf16 MXU operands, f32 accumulation): looser value tolerance,
    # but masking and row-normalization properties still hold exactly.
    out_bf16 = jax.block_until_ready(
        attention_forward(dec_input, enc_output, text_lengths, params))
    assert out_bf16.shape == (B, S)
    assert jnp.allclose(out_bf16, ref, rtol=5e-2, atol=1e-2)
    assert jnp.all(out_bf16[0, 5:] == 0.0)
    assert bool(jnp.all(jnp.abs(out_bf16.sum(-1) - 1.0) < 1e-5))

    print("KERNEL_OK")
</pallas_src>

<mosaic_0001>
module attributes {stable_mosaic.version = 11 : i64} {
  func.func @attention_kernel(%arg0: i32, %arg1: memref<16x16x64xf32, #tpu.memory_space<vmem>>, %arg2: memref<16x32xf32, #tpu.memory_space<vmem>>, %arg3: memref<16x1xi32, #tpu.memory_space<vmem>>, %arg4: memref<64x32xf32, #tpu.memory_space<vmem>>, %arg5: memref<32x32xf32, #tpu.memory_space<vmem>>, %arg6: memref<1x32xf32, #tpu.memory_space<vmem>>, %arg7: memref<1x32xf32, #tpu.memory_space<vmem>>, %arg8: memref<1x1xf32, #tpu.memory_space<smem>>, %arg9: memref<1x256xf32, #tpu.memory_space<vmem>>) attributes {dimension_semantics = [#tpu.dimension_semantics<parallel>], iteration_bounds = array<i64: 1>, scalar_prefetch = 0 : i64, scratch_operands = 0 : i64, tpu.core_type = #tpu.core_type<tc>, window_params = [{transform_indices = @transform_0, window_bounds = array<i64: 16, 16, 64>}, {transform_indices = @transform_1, window_bounds = array<i64: 16, 32>}, {transform_indices = @transform_2, window_bounds = array<i64: 16, 1>}, {pipeline_mode = #tpu.pipeline_mode<synchronous>, transform_indices = @transform_3, window_bounds = array<i64: 64, 32>}, {pipeline_mode = #tpu.pipeline_mode<synchronous>, transform_indices = @transform_4, window_bounds = array<i64: 32, 32>}, {pipeline_mode = #tpu.pipeline_mode<synchronous>, transform_indices = @transform_5, window_bounds = array<i64: 1, 32>}, {pipeline_mode = #tpu.pipeline_mode<synchronous>, transform_indices = @transform_6, window_bounds = array<i64: 1, 32>}, {transform_indices = @transform_7, window_bounds = array<i64: 1, 1>}, {transform_indices = @transform_8, window_bounds = array<i64: 1, 256>}]} {
    %c0 = arith.constant 0 : index
    %c0_0 = arith.constant 0 : index
    %c0_1 = arith.constant 0 : index
    %0 = vector.load %arg1[%c0, %c0_0, %c0_1] : memref<16x16x64xf32, #tpu.memory_space<vmem>>, vector<16x16x64xf32>
    %1 = vector.shape_cast %0 : vector<16x16x64xf32> to vector<256x64xf32>
    %c0_2 = arith.constant 0 : index
    %c0_3 = arith.constant 0 : index
    %2 = vector.load %arg4[%c0_2, %c0_3] : memref<64x32xf32, #tpu.memory_space<vmem>>, vector<64x32xf32>
    %cst = arith.constant dense<0.000000e+00> : vector<256x32xf32>
    %3 = tpu.matmul %1, %2, %cst {dimension_numbers = #tpu.dot_dimension_numbers<[1], [0], [0], [1], [0, 0, 1, 1], [], []>} : vector<256x64xf32>, vector<64x32xf32>, vector<256x32xf32> -> vector<256x32xf32>
    %c0_4 = arith.constant 0 : index
    %c0_5 = arith.constant 0 : index
    %4 = vector.load %arg2[%c0_4, %c0_5] : memref<16x32xf32, #tpu.memory_space<vmem>>, vector<16x32xf32>
    %c0_6 = arith.constant 0 : index
    %c0_7 = arith.constant 0 : index
    %5 = vector.load %arg5[%c0_6, %c0_7] : memref<32x32xf32, #tpu.memory_space<vmem>>, vector<32x32xf32>
    %cst_8 = arith.constant dense<0.000000e+00> : vector<16x32xf32>
    %6 = tpu.matmul %4, %5, %cst_8 {dimension_numbers = #tpu.dot_dimension_numbers<[1], [0], [0], [1], [0, 0, 1, 1], [], []>} : vector<16x32xf32>, vector<32x32xf32>, vector<16x32xf32> -> vector<16x32xf32>
    %c0_9 = arith.constant 0 : index
    %c0_10 = arith.constant 0 : index
    %7 = vector.load %arg6[%c0_9, %c0_10] : memref<1x32xf32, #tpu.memory_space<vmem>>, vector<1x32xf32>
    %8 = vector.broadcast %7 : vector<1x32xf32> to vector<16x32xf32>
    %9 = arith.addf %6, %8 : vector<16x32xf32>
    %10 = vector.shape_cast %3 : vector<256x32xf32> to vector<16x16x32xf32>
    %11 = vector.shape_cast %9 : vector<16x32xf32> to vector<16x1x32xf32>
    %12 = vector.broadcast %11 : vector<16x1x32xf32> to vector<16x16x32xf32>
    %13 = arith.addf %10, %12 : vector<16x16x32xf32>
    %14 = math.tanh %13 : vector<16x16x32xf32>
    %c0_11 = arith.constant 0 : index
    %c0_12 = arith.constant 0 : index
    %15 = vector.load %arg7[%c0_11, %c0_12] : memref<1x32xf32, #tpu.memory_space<vmem>>, vector<1x32xf32>
    %16 = vector.shape_cast %15 : vector<1x32xf32> to vector<1x1x32xf32>
    %17 = vector.broadcast %16 : vector<1x1x32xf32> to vector<16x16x32xf32>
    %18 = arith.mulf %14, %17 : vector<16x16x32xf32>
    %cst_13 = arith.constant dense<0.000000e+00> : vector<16x16xf32>
    %19 = vector.multi_reduction <add>, %18, %cst_13 [2] : vector<16x16x32xf32> to vector<16x16xf32>
    %c0_14 = arith.constant 0 : index
    %c0_15 = arith.constant 0 : index
    %20 = memref.load %arg8[%c0_14, %c0_15] : memref<1x1xf32, #tpu.memory_space<smem>>
    %21 = vector.broadcast %20 : f32 to vector<16x16xf32>
    %22 = arith.addf %19, %21 : vector<16x16xf32>
    %23 = tpu.iota {dimensions = array<i32: 1>} : vector<16x16xi32>
    %c0_16 = arith.constant 0 : index
    %c0_17 = arith.constant 0 : index
    %24 = vector.load %arg3[%c0_16, %c0_17] : memref<16x1xi32, #tpu.memory_space<vmem>>, vector<16x1xi32>
    %25 = vector.broadcast %24 : vector<16x1xi32> to vector<16x16xi32>
    %26 = arith.cmpi sge, %23, %25 : vector<16x16xi32>
    %cst_18 = arith.constant -1.000000e+30 : f32
    %27 = vector.broadcast %cst_18 : f32 to vector<16x16xf32>
    %28 = arith.select %26, %27, %22 : vector<16x16xi1>, vector<16x16xf32>
    %cst_19 = arith.constant dense<0xFF800000> : vector<16xf32>
    %29 = vector.multi_reduction <maximumf>, %28, %cst_19 [1] : vector<16x16xf32> to vector<16xf32>
    %30 = vector.shape_cast %29 : vector<16xf32> to vector<16x1xf32>
    %31 = vector.broadcast %30 : vector<16x1xf32> to vector<16x16xf32>
    %32 = arith.subf %28, %31 : vector<16x16xf32>
    %33 = math.exp %32 : vector<16x16xf32>
    %cst_20 = arith.constant dense<0.000000e+00> : vector<16xf32>
    %34 = vector.multi_reduction <add>, %33, %cst_20 [1] : vector<16x16xf32> to vector<16xf32>
    %35 = vector.shape_cast %34 : vector<16xf32> to vector<16x1xf32>
    %36 = tpu.reciprocal %35 : vector<16x1xf32> -> vector<16x1xf32>
    %37 = vector.broadcast %36 : vector<16x1xf32> to vector<16x16xf32>
    %38 = arith.mulf %33, %37 : vector<16x16xf32>
    %39 = vector.shape_cast %38 : vector<16x16xf32> to vector<1x256xf32>
    %c0_21 = arith.constant 0 : index
    %c0_22 = arith.constant 0 : index
    %40 = vector.load %arg9[%c0_21, %c0_22] : memref<1x256xf32, #tpu.memory_space<vmem>>, vector<1x256xf32>
    tpu.vector_store %arg9[%c0_21, %c0_22], %39 {strides = array<i32>} : memref<1x256xf32, #tpu.memory_space<vmem>>, vector<1x256xf32>,
    return
  }
  func.func @transform_0(%arg0: i32) -> (i32, i32, i32) {
    %c0_i32 = arith.constant 0 : i32
    %c0_i32_0 = arith.constant 0 : i32
    %c0_i32_1 = arith.constant 0 : i32
    return %arg0, %c0_i32, %c0_i32_0 : i32, i32, i32
  }
  func.func @transform_1(%arg0: i32) -> (i32, i32) {
    %c0_i32 = arith.constant 0 : i32
    %c0_i32_0 = arith.constant 0 : i32
    return %arg0, %c0_i32 : i32, i32
  }
  func.func @transform_2(%arg0: i32) -> (i32, i32) {
    %c0_i32 = arith.constant 0 : i32
    %c0_i32_0 = arith.constant 0 : i32
    return %arg0, %c0_i32 : i32, i32
  }
  func.func @transform_3(%arg0: i32) -> (i32, i32) {
    %c0_i32 = arith.constant 0 : i32
    %c0_i32_0 = arith.constant 0 : i32
    %c0_i32_1 = arith.constant 0 : i32
    return %c0_i32, %c0_i32_0 : i32, i32
  }
  func.func @transform_4(%arg0: i32) -> (i32, i32) {
    %c0_i32 = arith.constant 0 : i32
    %c0_i32_0 = arith.constant 0 : i32
    %c0_i32_1 = arith.constant 0 : i32
    return %c0_i32, %c0_i32_0 : i32, i32
  }
  func.func @transform_5(%arg0: i32) -> (i32, i32) {
    %c0_i32 = arith.constant 0 : i32
    %c0_i32_0 = arith.constant 0 : i32
    %c0_i32_1 = arith.constant 0 : i32
    return %c0_i32, %c0_i32_0 : i32, i32
  }
  func.func @transform_6(%arg0: i32) -> (i32, i32) {
    %c0_i32 = arith.constant 0 : i32
    %c0_i32_0 = arith.constant 0 : i32
    %c0_i32_1 = arith.constant 0 : i32
    return %c0_i32, %c0_i32_0 : i32, i32
  }
  func.func @transform_7(%arg0: i32) -> (i32, i32) {
    %c0_i32 = arith.constant 0 : i32
    %c0_i32_0 = arith.constant 0 : i32
    %c0_i32_1 = arith.constant 0 : i32
    return %c0_i32, %c0_i32_0 : i32, i32
  }
  func.func @transform_8(%arg0: i32) -> (i32, i32) {
    %c0_i32 = arith.constant 0 : i32
    %c0_i32_0 = arith.constant 0 : i32
    return %arg0, %c0_i32 : i32, i32
  }
}

module attributes {stable_mosaic.version = 11 : i64} {
  func.func @attention_kernel(%arg0: i32, %arg1: memref<16x16x64xf32, #tpu.memory_space<vmem>>, %arg2: memref<16x32xf32, #tpu.memory_space<vmem>>, %arg3: memref<16x1xi32, #tpu.memory_space<vmem>>, %arg4: memref<64x32xf32, #tpu.memory_space<vmem>>, %arg5: memref<32x32xf32, #tpu.memory_space<vmem>>, %arg6: memref<1x32xf32, #tpu.memory_space<vmem>>, %arg7: memref<1x32xf32, #tpu.memory_space<vmem>>, %arg8: memref<1x1xf32, #tpu.memory_space<smem>>, %arg9: memref<16x16xf32, #tpu.memory_space<vmem>>) attributes {dimension_semantics = [#tpu.dimension_semantics<parallel>], iteration_bounds = array<i64: 1>, scalar_prefetch = 0 : i64, scratch_operands = 0 : i64, tpu.core_type = #tpu.core_type<tc>, window_params = [{transform_indices = @transform_0, window_bounds = array<i64: 16, 16, 64>}, {transform_indices = @transform_1, window_bounds = array<i64: 16, 32>}, {transform_indices = @transform_2, window_bounds = array<i64: 16, 1>}, {pipeline_mode = #tpu.pipeline_mode<synchronous>, transform_indices = @transform_3, window_bounds = array<i64: 64, 32>}, {pipeline_mode = #tpu.pipeline_mode<synchronous>, transform_indices = @transform_4, window_bounds = array<i64: 32, 32>}, {pipeline_mode = #tpu.pipeline_mode<synchronous>, transform_indices = @transform_5, window_bounds = array<i64: 1, 32>}, {pipeline_mode = #tpu.pipeline_mode<synchronous>, transform_indices = @transform_6, window_bounds = array<i64: 1, 32>}, {transform_indices = @transform_7, window_bounds = array<i64: 1, 1>}, {transform_indices = @transform_8, window_bounds = array<i64: 16, 16>}]} {
    %c0 = arith.constant 0 : index
    %c0_0 = arith.constant 0 : index
    %c0_1 = arith.constant 0 : index
    %0 = vector.load %arg1[%c0, %c0_0, %c0_1] : memref<16x16x64xf32, #tpu.memory_space<vmem>>, vector<16x16x64xf32>
    %1 = vector.shape_cast %0 : vector<16x16x64xf32> to vector<256x64xf32>
    %c0_2 = arith.constant 0 : index
    %c0_3 = arith.constant 0 : index
    %2 = vector.load %arg4[%c0_2, %c0_3] : memref<64x32xf32, #tpu.memory_space<vmem>>, vector<64x32xf32>
    %cst = arith.constant dense<0.000000e+00> : vector<256x32xf32>
    %3 = tpu.matmul %1, %2, %cst {dimension_numbers = #tpu.dot_dimension_numbers<[1], [0], [0], [1], [0, 0, 1, 1], [], []>} : vector<256x64xf32>, vector<64x32xf32>, vector<256x32xf32> -> vector<256x32xf32>
    %c0_4 = arith.constant 0 : index
    %c0_5 = arith.constant 0 : index
    %4 = vector.load %arg2[%c0_4, %c0_5] : memref<16x32xf32, #tpu.memory_space<vmem>>, vector<16x32xf32>
    %c0_6 = arith.constant 0 : index
    %c0_7 = arith.constant 0 : index
    %5 = vector.load %arg5[%c0_6, %c0_7] : memref<32x32xf32, #tpu.memory_space<vmem>>, vector<32x32xf32>
    %cst_8 = arith.constant dense<0.000000e+00> : vector<16x32xf32>
    %6 = tpu.matmul %4, %5, %cst_8 {dimension_numbers = #tpu.dot_dimension_numbers<[1], [0], [0], [1], [0, 0, 1, 1], [], []>} : vector<16x32xf32>, vector<32x32xf32>, vector<16x32xf32> -> vector<16x32xf32>
    %c0_9 = arith.constant 0 : index
    %c0_10 = arith.constant 0 : index
    %7 = vector.load %arg6[%c0_9, %c0_10] : memref<1x32xf32, #tpu.memory_space<vmem>>, vector<1x32xf32>
    %8 = vector.broadcast %7 : vector<1x32xf32> to vector<16x32xf32>
    %9 = arith.addf %6, %8 : vector<16x32xf32>
    %10 = vector.shape_cast %3 : vector<256x32xf32> to vector<16x16x32xf32>
    %11 = vector.shape_cast %9 : vector<16x32xf32> to vector<16x1x32xf32>
    %12 = vector.broadcast %11 : vector<16x1x32xf32> to vector<16x16x32xf32>
    %13 = arith.addf %10, %12 : vector<16x16x32xf32>
    %14 = math.tanh %13 : vector<16x16x32xf32>
    %c0_11 = arith.constant 0 : index
    %c0_12 = arith.constant 0 : index
    %15 = vector.load %arg7[%c0_11, %c0_12] : memref<1x32xf32, #tpu.memory_space<vmem>>, vector<1x32xf32>
    %16 = vector.shape_cast %15 : vector<1x32xf32> to vector<1x1x32xf32>
    %17 = vector.broadcast %16 : vector<1x1x32xf32> to vector<16x16x32xf32>
    %18 = arith.mulf %14, %17 : vector<16x16x32xf32>
    %cst_13 = arith.constant dense<0.000000e+00> : vector<16x16xf32>
    %19 = vector.multi_reduction <add>, %18, %cst_13 [2] : vector<16x16x32xf32> to vector<16x16xf32>
    %c0_14 = arith.constant 0 : index
    %c0_15 = arith.constant 0 : index
    %20 = memref.load %arg8[%c0_14, %c0_15] : memref<1x1xf32, #tpu.memory_space<smem>>
    %21 = vector.broadcast %20 : f32 to vector<16x16xf32>
    %22 = arith.addf %19, %21 : vector<16x16xf32>
    %23 = tpu.iota {dimensions = array<i32: 1>} : vector<16x16xi32>
    %c0_16 = arith.constant 0 : index
    %c0_17 = arith.constant 0 : index
    %24 = vector.load %arg3[%c0_16, %c0_17] : memref<16x1xi32, #tpu.memory_space<vmem>>, vector<16x1xi32>
    %25 = vector.broadcast %24 : vector<16x1xi32> to vector<16x16xi32>
    %26 = arith.cmpi sge, %23, %25 : vector<16x16xi32>
    %cst_18 = arith.constant -1.000000e+30 : f32
    %27 = vector.broadcast %cst_18 : f32 to vector<16x16xf32>
    %28 = arith.select %26, %27, %22 : vector<16x16xi1>, vector<16x16xf32>
    %cst_19 = arith.constant dense<0xFF800000> : vector<16xf32>
    %29 = vector.multi_reduction <maximumf>, %28, %cst_19 [1] : vector<16x16xf32> to vector<16xf32>
    %30 = vector.shape_cast %29 : vector<16xf32> to vector<16x1xf32>
    %31 = vector.broadcast %30 : vector<16x1xf32> to vector<16x16xf32>
    %32 = arith.subf %28, %31 : vector<16x16xf32>
    %33 = math.exp %32 : vector<16x16xf32>
    %cst_20 = arith.constant dense<0.000000e+00> : vector<16xf32>
    %34 = vector.multi_reduction <add>, %33, %cst_20 [1] : vector<16x16xf32> to vector<16xf32>
    %35 = vector.shape_cast %34 : vector<16xf32> to vector<16x1xf32>
    %36 = tpu.reciprocal %35 : vector<16x1xf32> -> vector<16x1xf32>
    %37 = vector.broadcast %36 : vector<16x1xf32> to vector<16x16xf32>
    %38 = arith.mulf %33, %37 : vector<16x16xf32>
    %c0_21 = arith.constant 0 : index
    %c0_22 = arith.constant 0 : index
    %39 = vector.load %arg9[%c0_21, %c0_22] : memref<16x16xf32, #tpu.memory_space<vmem>>, vector<16x16xf32>
    tpu.vector_store %arg9[%c0_21, %c0_22], %38 {strides = array<i32>} : memref<16x16xf32, #tpu.memory_space<vmem>>, vector<16x16xf32>,
    return
  }
  func.func @transform_0(%arg0: i32) -> (i32, i32, i32) {
    %c0_i32 = arith.constant 0 : i32
    %c0_i32_0 = arith.constant 0 : i32
    %c0_i32_1 = arith.constant 0 : i32
    return %arg0, %c0_i32, %c0_i32_0 : i32, i32, i32
  }
  func.func @transform_1(%arg0: i32) -> (i32, i32) {
    %c0_i32 = arith.constant 0 : i32
    %c0_i32_0 = arith.constant 0 : i32
    return %arg0, %c0_i32 : i32, i32
  }
  func.func @transform_2(%arg0: i32) -> (i32, i32) {
    %c0_i32 = arith.constant 0 : i32
    %c0_i32_0 = arith.constant 0 : i32
    return %arg0, %c0_i32 : i32, i32
  }
  func.func @transform_3(%arg0: i32) -> (i32, i32) {
    %c0_i32 = arith.constant 0 : i32
    %c0_i32_0 = arith.constant 0 : i32
    %c0_i32_1 = arith.constant 0 : i32
    return %c0_i32, %c0_i32_0 : i32, i32
  }
  func.func @transform_4(%arg0: i32) -> (i32, i32) {
    %c0_i32 = arith.constant 0 : i32
    %c0_i32_0 = arith.constant 0 : i32
    %c0_i32_1 = arith.constant 0 : i32
    return %c0_i32, %c0_i32_0 : i32, i32
  }
  func.func @transform_5(%arg0: i32) -> (i32, i32) {
    %c0_i32 = arith.constant 0 : i32
    %c0_i32_0 = arith.constant 0 : i32
    %c0_i32_1 = arith.constant 0 : i32
    return %c0_i32, %c0_i32_0 : i32, i32
  }
  func.func @transform_6(%arg0: i32) -> (i32, i32) {
    %c0_i32 = arith.constant 0 : i32
    %c0_i32_0 = arith.constant 0 : i32
    %c0_i32_1 = arith.constant 0 : i32
    return %c0_i32, %c0_i32_0 : i32, i32
  }
  func.func @transform_7(%arg0: i32) -> (i32, i32) {
    %c0_i32 = arith.constant 0 : i32
    %c0_i32_0 = arith.constant 0 : i32
    %c0_i32_1 = arith.constant 0 : i32
    return %c0_i32, %c0_i32_0 : i32, i32
  }
  func.func @transform_8(%arg0: i32) -> (i32, i32) {
    %c0_i32 = arith.constant 0 : i32
    %c0_i32_0 = arith.constant 0 : i32
    return %arg0, %c0_i32 : i32, i32
  }
}

</mosaic_0001>

<bundles_post_ra>
// kernel: tpu_custom_call.1
= control target key start
LH: loop header
LB: loop body
LE: loop exit
PB: predicated region body
PF: predicated region fallthrough
CT: control target
= control target key end

     0   :  { %14 = vsyncpa [#allocation4], 0  ;;  %s2292_s0 = inlined_call_operand.hbm [shape: f32[16,16,64], index: 0, kind: input, shape index: {}]   ;;  %s2293_s1 = inlined_call_operand.hbm [shape: f32[16,32], index: 1, kind: input, shape index: {}]   ;;  %s2294_s2 = inlined_call_operand.hbm [shape: s32[16,1], index: 2, kind: input, shape index: {}]   ;;  %s2295_s3 = inlined_call_operand.hbm [shape: f32[64,32], index: 3, kind: input, shape index: {}]   ;;  %s2296_s4 = inlined_call_operand.hbm [shape: f32[32,32], index: 4, kind: input, shape index: {}]   ;;  %s2297_s5 = inlined_call_operand.hbm [shape: f32[1,32], index: 5, kind: input, shape index: {}]   ;;  %s2298_s6 = inlined_call_operand.hbm [shape: f32[1,32], index: 6, kind: input, shape index: {}]   ;;  %s2299_s7 = inlined_call_operand.<no memory space> [shape: f32[1,1], index: 7, kind: input, shape index: {}]   ;;  %s2300_s8 = inlined_call_operand.hbm [shape: f32[16,16], index: 8, kind: output, shape index: {}]  }
   0x1   :  { %15 = vsyncpa [#allocation7], 0 }
   0x2   :  { %16 = vsyncpa [#allocation10], 0 }
   0x3   :  { %17 = vsyncpa [#allocation13], 0 }
   0x4   :  { %18 = vsyncpa [#allocation5], 0  ;;  %s1713_s27 = smov [#allocation6]   ;;  %s1714_s29 = smov [#allocation9]  }
   0x5   :  { %s36_s28 = sshll.u32 %s1713_s27, 4  ;;  %s60_s30 = sshll.u32 %s1714_s29, 4  ;;  %s37_s28 = int_to_ptr.vmem [resolvable:$true] %s36_s28  ;;  %s1770_s30 = int_to_ptr.vmem [resolvable:$true] %s60_s30 }
   0x6   :  { %s1527_s11 = scalar_lea.hbm %s2293_s1, 256 }
   0x7   :  { %p1528_p0 = scmp.ne.s32.totalorder %s2293_s1, %s1527_s11  ;;  %p1531_p1 = scmp.lt.u32.totalorder %s1527_s11, %s2293_s1 }
   0x9   :  { %p1533_p2 = pnand %p1531_p1, %p1528_p0 }
   0xb   :  { %1536 = shalt.err (!%p1533_p2)
}
   0xc   :  { %s1537_s16 = scalar_lea.vmem %s37_s28, 256  ;;  %p1542_p4 = scmp.lt.s32.totalorder %s37_s28, %s37_s28 }
   0xd   :  { %p1538_p3 = scmp.ne.s32.totalorder %s37_s28, %s1537_s16  ;;  %p1543_p5 = scmp.lt.s32.totalorder %s1537_s16, %s1537_s16 }
   0xf   :  { %p1544_p6 = por %p1543_p5, %p1542_p4 }
  0x11   :  { %p1545_p7 = pnand %p1544_p6, %p1538_p3 }
  0x13   :  { %1548 = shalt.err (!%p1545_p7)
}
  0x14   :  { %s1715_s17 = smov 128   ;;  %s1716_s18 = smov 8  }
  0x15   :  { %42 = dma.hbm_to_vmem [thread:$0]  %s2293_s1, 256, %s37_s28, [#allocation7], %s1715_s17, %s1715_s17, %s1716_s18  }
  0x16   :  { %s1549_s23 = scalar_lea.hbm %s2295_s3, 1024 }
  0x17   :  { %p1550_p8 = scmp.ne.s32.totalorder %s2295_s3, %s1549_s23  ;;  %p1553_p9 = scmp.lt.u32.totalorder %s1549_s23, %s2295_s3 }
  0x19   :  { %p1555_p10 = pnand %p1553_p9, %p1550_p8 }
  0x1b   :  { %1558 = shalt.err (!%p1555_p10)
}
  0x1c   :  { %s1559_s29 = scalar_lea.vmem %s1770_s30, 1024  ;;  %p1564_p12 = scmp.lt.s32.totalorder %s1770_s30, %s1770_s30 }
  0x1d   :  { %p1560_p11 = scmp.ne.s32.totalorder %s1770_s30, %s1559_s29  ;;  %p1565_p13 = scmp.lt.s32.totalorder %s1559_s29, %s1559_s29 }
  0x1f   :  { %p1566_p0 = por %p1565_p13, %p1564_p12 }
  0x21   :  { %p1567_p1 = pnand %p1566_p0, %p1560_p11 }
  0x23   :  { %1570 = shalt.err (!%p1567_p1)
}
  0x24   :  { %66 = dma.hbm_to_vmem [thread:$0]  %s2295_s3, 1024, %s1770_s30, [#allocation10], %s1715_s17, %s1715_s17, %s1716_s18  }
  0x25   :  { %s1717_s9 = smov [#allocation12]   ;;  %s1718_s11 = smov [#allocation3]  }
  0x26   :  { %s85_s10 = sshll.u32 %s1717_s9, 4  ;;  %s24_s12 = sshll.u32 %s1718_s11, 4  ;;  %s86_s10 = int_to_ptr.vmem [resolvable:$true] %s85_s10  ;;  %s1807_s12 = int_to_ptr.vmem [resolvable:$true] %s24_s12 }
  0x27   :  { %s1571_s15 = scalar_lea.hbm %s2297_s5, 16 }
  0x28   :  { %p1572_p2 = scmp.ne.s32.totalorder %s2297_s5, %s1571_s15  ;;  %p1575_p3 = scmp.lt.u32.totalorder %s1571_s15, %s2297_s5 }
  0x2a   :  { %p1577_p4 = pnand %p1575_p3, %p1572_p2 }
  0x2c   :  { %1580 = shalt.err (!%p1577_p4)
}
  0x2d   :  { %s1581_s3 = scalar_lea.vmem %s86_s10, 16  ;;  %s1585_s30 = scalar_lea.vmem %s86_s10, 32 }
  0x2e   :  { %p1582_p5 = scmp.ne.s32.totalorder %s86_s10, %s1581_s3  ;;  %p1586_p6 = scmp.lt.s32.totalorder %s86_s10, %s86_s10 }
  0x2f   :  { %p1587_p7 = scmp.lt.s32.totalorder %s1585_s30, %s1581_s3 }
  0x31   :  { %p1588_p8 = por %p1587_p7, %p1586_p6 }
  0x33   :  { %p1589_p9 = pnand %p1588_p8, %p1582_p5 }
  0x35   :  { %1592 = shalt.err (!%p1589_p9)
}
  0x36   :  { %88 = dma.hbm_to_vmem [thread:$0]  %s2297_s5, 16, %s86_s10, [#allocation13]  }
  0x37   :  { %s1593_s26 = scalar_lea.hbm %s2292_s0, 4096 }
  0x38   :  { %p1594_p10 = scmp.ne.s32.totalorder %s2292_s0, %s1593_s26  ;;  %p1597_p11 = scmp.lt.u32.totalorder %s1593_s26, %s2292_s0 }
  0x3a   :  { %p1599_p12 = pnand %p1597_p11, %p1594_p10 }
  0x3c   :  { %1602 = shalt.err (!%p1599_p12)
}
  0x3d   :  { %s1603_s9 = scalar_lea.vmem %s1807_s12, 4096  ;;  %p1608_p0 = scmp.lt.s32.totalorder %s1807_s12, %s1807_s12 }
  0x3e   :  { %p1604_p13 = scmp.ne.s32.totalorder %s1807_s12, %s1603_s9  ;;  %p1609_p1 = scmp.lt.s32.totalorder %s1603_s9, %s1603_s9 }
  0x40   :  { %p1610_p2 = por %p1609_p1, %p1608_p0 }
  0x42   :  { %p1611_p3 = pnand %p1610_p2, %p1604_p13 }
  0x44   :  { %1614 = shalt.err (!%p1611_p3)
}
  0x45   :  { %30 = dma.hbm_to_vmem [thread:$0]  %s2292_s0, 4096, %s1807_s12, [#allocation4], %s1715_s17, %s1715_s17, %s1716_s18  }
  0x46   :  { %s1719_s11 = smov [#allocation8]   ;;  %s1720_s14 = smov [#allocation11]  }
  0x47   :  { %s48_s13 = sshll.u32 %s1719_s11, 4  ;;  %s72_s15 = sshll.u32 %s1720_s14, 4  ;;  %s49_s13 = int_to_ptr.vmem [resolvable:$true] %s48_s13  ;;  %s1841_s15 = int_to_ptr.vmem [resolvable:$true] %s72_s15 }
  0x48   :  { %s1615_s20 = scalar_lea.hbm %s2294_s2, 256 }
  0x49   :  { %p1616_p4 = scmp.ne.s32.totalorder %s2294_s2, %s1615_s20  ;;  %p1619_p5 = scmp.lt.u32.totalorder %s1615_s20, %s2294_s2 }
  0x4b   :  { %p1621_p6 = pnand %p1619_p5, %p1616_p4 }
  0x4d   :  { %1624 = shalt.err (!%p1621_p6)
}
  0x4e   :  { %s1625_s0 = scalar_lea.vmem %s49_s13, 256  ;;  %p1630_p8 = scmp.lt.s32.totalorder %s49_s13, %s49_s13 }
  0x4f   :  { %p1626_p7 = scmp.ne.s32.totalorder %s49_s13, %s1625_s0  ;;  %p1631_p9 = scmp.lt.s32.totalorder %s1625_s0, %s1625_s0 }
  0x51   :  { %p1632_p10 = por %p1631_p9, %p1630_p8 }
  0x53   :  { %p1633_p11 = pnand %p1632_p10, %p1626_p7 }
  0x55   :  { %1636 = shalt.err (!%p1633_p11)
}
  0x56   :  { %54 = dma.hbm_to_vmem [thread:$0]  %s2294_s2, 256, %s49_s13, [#allocation7], %s1715_s17, %s1715_s17, %s1716_s18  }
  0x57   :  { %s1637_s26 = scalar_lea.hbm %s2296_s4, 512 }
  0x58   :  { %p1638_p12 = scmp.ne.s32.totalorder %s2296_s4, %s1637_s26  ;;  %p1641_p13 = scmp.lt.u32.totalorder %s1637_s26, %s2296_s4 }
  0x5a   :  { %p1643_p0 = pnand %p1641_p13, %p1638_p12 }
  0x5c   :  { %1646 = shalt.err (!%p1643_p0)
}
  0x5d   :  { %s1647_s9 = scalar_lea.vmem %s1841_s15, 512  ;;  %p1652_p2 = scmp.lt.s32.totalorder %s1841_s15, %s1841_s15 }
  0x5e   :  { %p1648_p1 = scmp.ne.s32.totalorder %s1841_s15, %s1647_s9  ;;  %p1653_p3 = scmp.lt.s32.totalorder %s1647_s9, %s1647_s9 }
  0x60   :  { %p1654_p4 = por %p1653_p3, %p1652_p2 }
  0x62   :  { %p1655_p5 = pnand %p1654_p4, %p1648_p1 }
  0x64   :  { %1658 = shalt.err (!%p1655_p5)
}
  0x65   :  { %78 = dma.hbm_to_vmem [thread:$0]  %s2296_s4, 512, %s1841_s15, [#allocation10], %s1715_s17, %s1715_s17, %s1716_s18  }
  0x66   :  { %s1721_s10 = smov [#allocation14]   ;;  %s1659_s16 = scalar_lea.hbm %s2298_s6, 16 }
  0x67   :  { %s95_s11 = sshll.u32 %s1721_s10, 4  ;;  %p1660_p6 = scmp.ne.s32.totalorder %s2298_s6, %s1659_s16  ;;  %s96_s11 = int_to_ptr.vmem [resolvable:$true] %s95_s11 }
  0x68   :  { %p1663_p7 = scmp.lt.u32.totalorder %s1659_s16, %s2298_s6 }
  0x6a   :  { %p1665_p8 = pnand %p1663_p7, %p1660_p6 }
  0x6c   :  { %1668 = shalt.err (!%p1665_p8)
}
  0x6d   :  { %s1669_s30 = scalar_lea.vmem %s96_s11, 16  ;;  %s1673_s4 = scalar_lea.vmem %s96_s11, 32 }
  0x6e   :  { %p1670_p9 = scmp.ne.s32.totalorder %s96_s11, %s1669_s30  ;;  %p1674_p10 = scmp.lt.s32.totalorder %s96_s11, %s96_s11 }
  0x6f   :  { %p1675_p11 = scmp.lt.s32.totalorder %s1673_s4, %s1669_s30 }
  0x71   :  { %p1676_p12 = por %p1675_p11, %p1674_p10 }
  0x73   :  { %p1677_p13 = pnand %p1676_p12, %p1670_p9 }
  0x75   :  { %1680 = shalt.err (!%p1677_p13)
}
  0x76   :  { %98 = dma.hbm_to_vmem [thread:$0]  %s2298_s6, 16, %s96_s11, [#allocation13]  }
  0x77   :  { %1703 = dma.done.wait [#allocation4], 4096  }
  0x78   :  { %1704 = vsyncadd [#allocation4], 4294963200 }
  0x79   :  { %1705 = dma.done.wait [#allocation7], 512  }
  0x7a   :  { %1706 = vsyncadd [#allocation7], 4294966784 }
  0x7b   :  { %1707 = dma.done.wait [#allocation10], 1536  }
  0x7c   :  { %1708 = vsyncadd [#allocation10], 4294965760 }
  0x7d   :  { %1709 = dma.done.wait [#allocation13], 32  }
  0x7e   :  { %1710 = vsyncadd [#allocation13], 4294967264  ;;  %v154_v0 = vld [vmem:[#allocation9] sm:$0xff]  ;;  %v155_v1 = vld [vmem:[#allocation9 + $0x8] sm:$0xff]  ;;  %vm162_vm0 = vcmask 523264   ;;  %vm497_vm1 = vcmask 261120  }
  0x7f   :  { %v156_v2 = vld [vmem:[#allocation9 + $0x10] sm:$0xff]  ;;  %v1409_v3 = vpack.c.bf16 %v155_v1, %v154_v0  ;;  %v157_v4 = vld [vmem:[#allocation9 + $0x18] sm:$0xff]  ;;  %v158_v6 = vld [vmem:[#allocation9 + $0x20] sm:$0xff]  ;;  %vm1045_vm2 = vcmask 130112   ;;  %vm1182_vm3 = vcmask 1041409   ;;  %vm1184_vm4 = vcmask 1042434  }
  0x80   :  { %v1413_v5 = vpack.c.bf16 %v157_v4, %v156_v2  ;;  %v159_v7 = vld [vmem:[#allocation9 + $0x28] sm:$0xff]  ;;  %v140_v8 = vld [vmem:[#allocation3 + $0x90] sm:$0xff]  ;;  %v122_v9 = vld [vmem:[#allocation3] sm:$0xff]  ;;  %vm1186_vm5 = vcmask 1043459   ;;  %vm1188_vm6 = vcmask 1044484   ;;  %vm1190_vm7 = vcmask 1045509  }
  0x81   :  { %1433 = vmatprep.subr.bf16.mxu1 %v1409_v3  ;;  %1410 = vmatprep.subr.bf16.mxu0 %v1409_v3  ;;  %v1417_v10 = vpack.c.bf16 %v159_v7, %v158_v6  ;;  %v160_v11 = vld [vmem:[#allocation9 + $0x30] sm:$0xff]  ;;  %v161_v12 = vld [vmem:[#allocation9 + $0x38] sm:$0xff]  ;;  %v486_v14 = vld [vmem:[#allocation11] sm:$0xff]  ;;  %vm1192_vm8 = vcmask 1046534   ;;  %vm1194_vm9 = vcmask 1047559   ;;  %vm1207_vm10 = vcmask 130048  }
  0x82   :  { %1437 = vmatpush3.bf16.msra.mxu1 %v1409_v3  ;;  %1412 = vmatpush3.bf16.msra.mxu0 %v1409_v3  ;;  %v1421_v13 = vpack.c.bf16 %v161_v12, %v160_v11  ;;  %v487_v15 = vld [vmem:[#allocation11 + $0x8] sm:$0xff]  ;;  %v488_v17 = vld [vmem:[#allocation11 + $0x10] sm:$0xff]  ;;  %v489_v18 = vld [vmem:[#allocation11 + $0x18] sm:$0xff]  ;;  %v585_v11 = vlaneseq }
  0x83   :  { %1434 = vmatprep.subr.bf16.mxu1 %v1413_v5  ;;  %1414 = vmatprep.subr.bf16.mxu0 %v1413_v5  ;;  %v1425_v16 = vpack.c.bf16 %v487_v15, %v486_v14  ;;  %v141_v19 = vld [vmem:[#allocation3 + $0x98] sm:$0xff]  ;;  %v123_v20 = vld [vmem:[#allocation3 + $0x8] sm:$0xff]  ;;  %v142_v21 = vld [vmem:[#allocation3 + $0xa0] sm:$0xff]  ;;  %v1429_v22 = vpack.c.bf16 %v489_v18, %v488_v17 }
  0x84   :  { %1377 = vmatprep.mubr.msk.f32.mxu1 %vm162_vm0, %v140_v8  ;;  %1350 = vmatprep.mubr.msk.f32.mxu0 %vm162_vm0, %v122_v9  ;;  %v124_v23 = vld [vmem:[#allocation3 + $0x10] sm:$0xff]  ;;  %v143_v24 = vld [vmem:[#allocation3 + $0xa8] sm:$0xff]  ;;  %v125_v25 = vld [vmem:[#allocation3 + $0x18] sm:$0xff]  ;;  %v1722_v8 = vmov 0   ;;  %v1723_v9 = vmov 1966171168  }
  0x85   :  { %v144_v26 = vld [vmem:[#allocation3 + $0xb0] sm:$0xff]  ;;  %v126_v27 = vld [vmem:[#allocation3 + $0x20] sm:$0xff]  ;;  %v145_v28 = vld [vmem:[#allocation3 + $0xb8] sm:$0xff]  ;;  %1454 = vset.pattern.permute.xlu1 %v1722_v8  ;;  %1453 = vset.pattern.permute.xlu0 %v1722_v8  ;;  %v1967_v17 = vshrl.u32 %v585_v11, 7 }
  0x86   :  { %1438 = vmatpush3.bf16.msra.mxu1 %v1413_v5  ;;  %1416 = vmatpush3.bf16.msra.mxu0 %v1413_v5  ;;  %v127_v29 = vld [vmem:[#allocation3 + $0x28] sm:$0xff]  ;;  %v146_v30 = vld [vmem:[#allocation3 + $0xc0] sm:$0xff]  ;;  %v128_v31 = vld [vmem:[#allocation3 + $0x30] sm:$0xff] }
  0x87   :  { %1435 = vmatprep.subr.bf16.mxu1 %v1417_v10  ;;  %1418 = vmatprep.subr.bf16.mxu0 %v1417_v10  ;;  %v147_v32 = vld [vmem:[#allocation3 + $0xc8] sm:$0xff]  ;;  %v129_v33 = vld [vmem:[#allocation3 + $0x38] sm:$0xff]  ;;  %v148_v34 = vld [vmem:[#allocation3 + $0xd0] sm:$0xff] }
  0x88   :  { %v130_v35 = vld [vmem:[#allocation3 + $0x40] sm:$0xff]  ;;  %v149_v36 = vld [vmem:[#allocation3 + $0xd8] sm:$0xff]  ;;  %v131_v37 = vld [vmem:[#allocation3 + $0x48] sm:$0xff] }
  0x89   :  { %v150_v38 = vld [vmem:[#allocation3 + $0xe0] sm:$0xff]  ;;  %v132_v39 = vld [vmem:[#allocation3 + $0x50] sm:$0xff]  ;;  %v151_v40 = vld [vmem:[#allocation3 + $0xe8] sm:$0xff] }
  0x8a   :  { %1439 = vmatpush3.bf16.msra.mxu1 %v1417_v10  ;;  %1420 = vmatpush3.bf16.msra.mxu0 %v1417_v10  ;;  %v133_v41 = vld [vmem:[#allocation3 + $0x58] sm:$0xff]  ;;  %v152_v42 = vld [vmem:[#allocation3 + $0xf0] sm:$0xff]  ;;  %v134_v43 = vld [vmem:[#allocation3 + $0x60] sm:$0xff]  ;;  %v583_v10 = vunpack.c.l.s4 %v1723_v9 }
  0x8b   :  { %1436 = vmatprep.subr.bf16.mxu1 %v1421_v13  ;;  %1422 = vmatprep.subr.bf16.mxu0 %v1421_v13  ;;  %v153_v44 = vld [vmem:[#allocation3 + $0xf8] sm:$0xff]  ;;  %v135_v45 = vld [vmem:[#allocation3 + $0x68] sm:$0xff]  ;;  %v484_v46 = vld [vmem:[#allocation6] sm:$0xff] }
  0x8c   :  { %v136_v47 = vld [vmem:[#allocation3 + $0x70] sm:$0xff]  ;;  %v485_v48 = vld [vmem:[#allocation6 + $0x8] sm:$0xff]  ;;  %v137_v49 = vld [vmem:[#allocation3 + $0x78] sm:$0xff] }
  0x8d   :  { %v138_v50 = vld [vmem:[#allocation3 + $0x80] sm:$0xff]  ;;  %v139_v51 = vld [vmem:[#allocation3 + $0x88] sm:$0xff] }
  0x8e   :  { %1440 = vmatpush3.bf16.msra.mxu1 %v1421_v13  ;;  %1424 = vmatpush3.bf16.msra.mxu0 %v1421_v13 }
  0x8f   :  { %1426 = vmatprep.subr.bf16.mxu1 %v1425_v16 }
  0x91   :  { %1378 = vmatmul.mubr.msk.f32.vlgmr.msra.gmra.mrb[0].mxu1 %vm162_vm0, %v141_v19  ;;  %1351 = vmatmul.mubr.msk.f32.vlgmr.msra.gmra.mrb[0].mxu0 %vm162_vm0, %v123_v20 }
  0x92   :  { %1428 = vmatpush3.bf16.msra.mxu1 %v1425_v16  ;;  %1380 = vmatprep.mubr.msk.f32.mxu1 %vm162_vm0, %v142_v21  ;;  %v584_v16 = vunpack.c.0.s8 %v583_v10 }
  0x93   :  { %1353 = vmatprep.mubr.msk.f32.mxu0 %vm162_vm0, %v124_v23  ;;  %1430 = vmatprep.subr.bf16.mxu1 %v1429_v22 }
  0x94   :  { %v1978_v23 = vsub.s32 %v584_v16, %v1967_v17 }
  0x95   :  { %1381 = vmatmul.mubr.msk.f32.gmra.mrb[2].mxu1 %vm162_vm0, %v143_v24  ;;  %1354 = vmatmul.mubr.msk.f32.gmra.mrb[2].mxu0 %vm162_vm0, %v125_v25 }
  0x96   :  { %1383 = vmatprep.mubr.msk.f32.mxu1 %vm162_vm0, %v144_v26  ;;  %1356 = vmatprep.mubr.msk.f32.mxu0 %vm162_vm0, %v126_v27 }
  0x97   :  { %1432 = vmatpush3.bf16.msra.mxu1 %v1429_v22  ;;  %v1284_v22 = vld [vmem:[#allocation12] ss:$0 sm:$0xff] }
  0x99   :  { %1384 = vmatmul.mubr.msk.f32.gmra.mrb[4].mxu1 %vm162_vm0, %v145_v28  ;;  %1357 = vmatmul.mubr.msk.f32.gmra.mrb[4].mxu0 %vm162_vm0, %v127_v29 }
  0x9a   :  { %1386 = vmatprep.mubr.msk.f32.mxu1 %vm162_vm0, %v146_v30  ;;  %1359 = vmatprep.mubr.msk.f32.mxu0 %vm162_vm0, %v128_v31 }
  0x9d   :  { %1387 = vmatmul.mubr.msk.f32.gmra.mrb[6].mxu1 %vm162_vm0, %v147_v32  ;;  %1360 = vmatmul.mubr.msk.f32.gmra.mrb[6].mxu0 %vm162_vm0, %v129_v33 }
  0x9e   :  { %1389 = vmatprep.mubr.msk.f32.mxu1 %vm162_vm0, %v148_v34  ;;  %1362 = vmatprep.mubr.msk.f32.mxu0 %vm162_vm0, %v130_v35 }
  0xa1   :  { %1390 = vmatmul.mubr.msk.f32.gmra.mrb[8].mxu1 %vm162_vm0, %v149_v36  ;;  %1363 = vmatmul.mubr.msk.f32.gmra.mrb[8].mxu0 %vm162_vm0, %v131_v37 }
  0xa2   :  { %1392 = vmatprep.mubr.msk.f32.mxu1 %vm162_vm0, %v150_v38  ;;  %1365 = vmatprep.mubr.msk.f32.mxu0 %vm162_vm0, %v132_v39 }
  0xa5   :  { %1393 = vmatmul.mubr.msk.f32.gmra.mrb[10].mxu1 %vm162_vm0, %v151_v40  ;;  %1366 = vmatmul.mubr.msk.f32.gmra.mrb[10].mxu0 %vm162_vm0, %v133_v41 }
  0xa6   :  { %1395 = vmatprep.mubr.msk.f32.mxu1 %vm162_vm0, %v152_v42  ;;  %1368 = vmatprep.mubr.msk.f32.mxu0 %vm162_vm0, %v134_v43 }
  0xa9   :  { %1396 = vmatmul.mubr.msk.f32.gmra.mrb[12].mxu1 %vm162_vm0, %v153_v44  ;;  %1369 = vmatmul.mubr.msk.f32.gmra.mrb[12].mxu0 %vm162_vm0, %v135_v45  ;;  %v681_v44 = vsub.s32 0, %v1967_v17 }
  0xaa   :  { %1406 = vmatprep.mubr.msk.f32.mxu1 %vm497_vm1, %v484_v46  ;;  %1371 = vmatprep.mubr.msk.f32.mxu0 %vm162_vm0, %v136_v47 }
  0xad   :  { %1407 = vmatmul.mubr.msk.f32.vlgmr.msra.gmra.mrb[14].mxu1 %vm497_vm1, %v485_v48  ;;  %1372 = vmatmul.mubr.msk.f32.gmra.mrb[14].mxu0 %vm162_vm0, %v137_v49 }
  0xae   :  { %1374 = vmatprep.mubr.msk.f32.mxu0 %vm162_vm0, %v138_v50 }
  0xb1   :  { %1375 = vmatmul.mubr.msk.f32.gmra.mrb[16].mxu0 %vm162_vm0, %v139_v51 }
 0x164   :  { %v1924_v52 = vpop.f32.mrb[0].mxu1  ;;  %v1926_v53 = vpop.f32.mrb[0].mxu0 }
 0x165   :  { %v1928_v54 = vpop.f32.mrb[1].mxu1  ;;  %v1930_v55 = vpop.f32.mrb[1].mxu0 }
 0x168   :  { %v1932_v56 = vpop.f32.mrb[2].mxu1  ;;  %v1934_v57 = vpop.f32.mrb[2].mxu0 }
 0x169   :  { %v1936_v58 = vpop.f32.mrb[3].mxu1  ;;  %v1938_v59 = vpop.f32.mrb[3].mxu0 }
 0x16c   :  { %v1940_v60 = vpop.f32.mrb[4].mxu1  ;;  %v1942_v61 = vpop.f32.mrb[4].mxu0 }
 0x16d   :  { %v1944_v62 = vpop.f32.mrb[5].mxu1  ;;  %v1946_v63 = vpop.f32.mrb[5].mxu0 }
 0x170   :  { %v1948_v0 = vpop.f32.mrb[6].mxu1  ;;  %v1950_v1 = vpop.f32.mrb[6].mxu0 }
 0x171   :  { %v445_v2 = vpop.f32.mrb[7].mxu1  ;;  %v1952_v3 = vpop.f32.mrb[7].mxu0 }
 0x174   :  { %v1954_v4 = vpop.f32.mrb[8].mxu1  ;;  %v1956_v5 = vpop.f32.mrb[8].mxu0 }
 0x175   :  { %v1958_v6 = vpop.f32.mrb[9].mxu1  ;;  %v1960_v7 = vpop.f32.mrb[9].mxu0 }
 0x178   :  { %v1394_v12 = vpop.f32.mrb[10].mxu1  ;;  %v1962_v13 = vpop.f32.mrb[10].mxu0 }
 0x179   :  { %v465_v14 = vpop.f32.mrb[11].mxu1  ;;  %v1964_v15 = vpop.f32.mrb[11].mxu0 }
 0x17c   :  { %v1969_v18 = vpop.f32.mrb[12].mxu1  ;;  %v1971_v19 = vpop.f32.mrb[12].mxu0 }
 0x17d   :  { %v1973_v20 = vpop.f32.mrb[13].mxu1  ;;  %v1975_v21 = vpop.f32.mrb[13].mxu0 }
 0x180   :  { %v1408_v24 = vpop.f32.mrb[14].mxu1  ;;  %v1980_v25 = vpop.f32.mrb[14].mxu0 }
 0x181   :  { %v576_v26 = vadd.f32 %v1408_v24, %v1284_v22  ;;  %v570_v27 = vpop.f32.mrb[15].mxu1  ;;  %v1982_v28 = vpop.f32.mrb[15].mxu0 }
 0x182   :  { %v571_v29 = vadd.f32 %v1284_v22, %v570_v27 }
 0x183   :  { %v630_v30 = vcombine.high %v576_v26, %v576_v26  ;;  %v637_v31 = vrot.slane %v576_v26, %v1978_v23 }
 0x184   :  { %v581_v32 = vcombine.high %v571_v29, %v571_v29  ;;  %v588_v33 = vrot.slane %v571_v29, %v1978_v23  ;;  %v1986_v34 = vpop.f32.mrb[16].mxu0 }
 0x185   :  { %v644_v35 = vrot.slane %v630_v30, %v1978_v23  ;;  %v645_v36 = vcombine.high %v637_v31, %v637_v31  ;;  %v1989_v37 = vpop.f32.mrb[17].mxu0  ;;  %v653_v47 = vrot.slane %v637_v31, %v1978_v23 }
 0x186   :  { %v595_v38 = vrot.slane %v581_v32, %v1978_v23  ;;  %v596_v39 = vcombine.high %v588_v33, %v588_v33  ;;  %v604_v40 = vrot.slane %v588_v33, %v1978_v23 }
 0x187   :  { %v646_v41 = vcombine.high %v644_v35, %v644_v35  ;;  %v660_v42 = vrot.slane %v644_v35, %v1978_v23  ;;  %v667_v43 = vrot.slane %v645_v36, %v1978_v23 }
 0x188   :  { %v611_v45 = vrot.slane %v595_v38, %v1978_v23  ;;  %v618_v46 = vrot.slane %v596_v39, %v1978_v23  ;;  %v626_v9 = vcombine.high %v604_v40, %v604_v40  ;;  %v682_v27 = vrot.slane %v604_v40, %v681_v44 }
 0x189   :  { %v674_v48 = vrot.slane %v646_v41, %v1978_v23  ;;  %v676_v49 = vcombine.high %v660_v42, %v660_v42  ;;  %v677_v50 = vcombine.high %v667_v43, %v667_v43  ;;  %v718_v51 = vrot.slane %v667_v43, %v681_v44 }
 0x18a   :  { %v730_v8 = vrot.slane %v660_v42, %v681_v44  ;;  %v627_v10 = vcombine.high %v611_v45, %v611_v45  ;;  %v628_v16 = vcombine.high %v618_v46, %v618_v46  ;;  %v690_v41 = vrot.slane %v626_v9, %v681_v44 }
 0x18b   :  { %v726_v22 = vrot.slane %v677_v50, %v681_v44  ;;  %v734_v24 = vrot.slane %v674_v48, %v681_v44  ;;  %v738_v26 = vrot.slane %v676_v49, %v681_v44  ;;  %v777_v29 = vadd.f32 %v718_v51, %v1928_v54 }
 0x18c   :  { %v778_v30 = vadd.f32 %v1924_v52, %v718_v51  ;;  %v2002_v32 = vadd.f32 %v730_v8, %v445_v2  ;;  %v784_v31 = vadd.f32 %v1948_v0, %v730_v8  ;;  %v678_v33 = vcombine.high %v674_v48, %v674_v48 }
 0x18d   :  { %v2006_v35 = vadd.f32 %v726_v22, %v1944_v62  ;;  %v2009_v36 = vadd.f32 %v1940_v60, %v726_v22  ;;  %v2012_v39 = vadd.f32 %v734_v24, %v1958_v6  ;;  %v2015_v40 = vadd.f32 %v1954_v4, %v734_v24 }
 0x18e   :  { %v2017_v54 = vadd.f32 %v738_v26, %v465_v14  ;;  %v2019_v52 = vadd.f32 %v1394_v12, %v738_v26  ;;  %v686_v2 = vrot.slane %v618_v46, %v681_v44  ;;  %v694_v0 = vrot.slane %v628_v16, %v681_v44 }
 0x18f   :  { %v675_v42 = vcombine.high %v653_v47, %v653_v47  ;;  %v597_v43 = vcombine.high %v595_v38, %v595_v38  ;;  %v698_v62 = vrot.slane %v611_v45, %v681_v44  ;;  %v706_v48 = vrot.slane %v627_v10, %v681_v44 }
 0x190   :  { %v759_v60 = vadd.f32 %v682_v27, %v1930_v55  ;;  %v742_v49 = vrot.slane %v678_v33, %v681_v44  ;;  %v760_v6 = vadd.f32 %v1926_v53, %v682_v27  ;;  %v761_v50 = vadd.f32 %v686_v2, %v1938_v59 }
 0x191   :  { %v762_v4 = vadd.f32 %v1934_v57, %v686_v2  ;;  %v2026_v14 = vadd.f32 %v690_v41, %v1946_v63  ;;  %v764_v12 = vadd.f32 %v1942_v61, %v690_v41  ;;  %v2030_v46 = vadd.f32 %v694_v0, %v1952_v3 }
 0x192   :  { %v2033_v38 = vadd.f32 %v1950_v1, %v694_v0  ;;  %v2036_v55 = vadd.f32 %v698_v62, %v1960_v7  ;;  %v768_v53 = vadd.f32 %v1956_v5, %v698_v62  ;;  %v2040_v59 = vadd.f32 %v706_v48, %v1975_v21 }
 0x193   :  { %v2043_v57 = vadd.f32 %v1971_v19, %v706_v48  ;;  %v625_v63 = vrot.slane %v597_v43, %v1978_v23  ;;  %v714_v61 = vrot.slane %v653_v47, %v681_v44  ;;  %v722_v45 = vrot.slane %v675_v42, %v681_v44 }
 0x194   :  { %v2047_v3 = vadd.f32 %v1969_v18, %v742_v49  ;;  %v2050_v7 = vadd.f32 %v742_v49, %v1973_v20  ;;  %1455 = vtanh.f32 %v778_v30 }
 0x195   :  { %v629_v1 = vcombine.high %v625_v63, %v625_v63  ;;  %v702_v51 = vrot.slane %v625_v63, %v681_v44  ;;  %v776_v5 = vadd.f32 %v1986_v34, %v714_v61  ;;  %v779_v21 = vadd.f32 %v722_v45, %v1936_v58 }
 0x196   :  { %v780_v8 = vadd.f32 %v1932_v56, %v722_v45  ;;  %v775_v18 = vadd.f32 %v714_v61, %v1989_v37  ;;  %v2068_v56 = vld [vmem:[#allocation14] ss:$0 sm:$0xff] }
 0x197   :  { %v710_v19 = vrot.slane %v629_v1, %v681_v44  ;;  %v2056_v9 = vadd.f32 %v702_v51, %v1964_v15  ;;  %v2059_v23 = vadd.f32 %v1962_v13, %v702_v51  ;;  %1457 = vtanh.f32 %v776_v5 }
 0x198   :  { %1459 = vtanh.f32 %v759_v60 }
 0x199   :  { %v2063_v47 = vadd.f32 %v1980_v25, %v710_v19  ;;  %v2066_v20 = vadd.f32 %v710_v19, %v1982_v28  ;;  %1461 = vtanh.f32 %v775_v18 }
 0x19a   :  { %1463 = vtanh.f32 %v780_v8 }
 0x19b   :  { %1465 = vtanh.f32 %v760_v6 }
 0x19c   :  { %1467 = vtanh.f32 %v784_v31 }
 0x19d   :  { %1469 = vtanh.f32 %v777_v29 }
 0x19e   :  { %v1456_v58 = vpop.eup %1455  ;;  %1471 = vtanh.f32 %v761_v50 }
 0x19f   :  { %v849_v37 = vmul.f32 %v1456_v58, %v2068_v56  ;;  %1473 = vtanh.f32 %v779_v21 }
 0x1a0   :  { %1475 = vtanh.f32 %v762_v4 }
 0x1a1   :  { %v1458_v13 = vpop.eup %1457  ;;  %v919_v26 = vsel %vm497_vm1, %v849_v37, 0.0  ;;  %1477 = vtanh.f32 %v2002_v32 }
 0x1a2   :  { %v847_v15 = vmul.f32 %v1458_v13, %v2068_v56  ;;  %v1460_v34 = vpop.eup %1459  ;;  %1479 = vtanh.f32 %v764_v12 }
 0x1a3   :  { %v1462_v25 = vpop.eup %1461  ;;  %v830_v22 = vmul.f32 %v1460_v34, %v2068_v56  ;;  %1481 = vtanh.f32 %v2026_v14 }
 0x1a4   :  { %v913_v28 = vsel %vm497_vm1, %v847_v15, 0.0  ;;  %v1464_v44 = vpop.eup %1463  ;;  %v846_v10 = vmul.f32 %v1462_v25, %v2068_v56  ;;  %1483 = vtanh.f32 %v768_v53 }
 0x1a5   :  { %914 = vadd.xlane.f32.xlu1 %v913_v28  ;;  %v1466_v24 = vpop.eup %1465  ;;  %v851_v27 = vmul.f32 %v1464_v44, %v2068_v56  ;;  %v862_v30 = vsel %vm497_vm1, %v830_v22, 0.0  ;;  %1485 = vtanh.f32 %v2036_v55 }
 0x1a6   :  { %v910_v16 = vsel %vm497_vm1, %v846_v10, 0.0  ;;  %v1468_v29 = vpop.eup %1467  ;;  %v831_v31 = vmul.f32 %v1466_v24, %v2068_v56  ;;  %1487 = vtanh.f32 %v2009_v36 }
 0x1a7   :  { %911 = vadd.xlane.f32.xlu0 %v910_v16  ;;  %v1470_v33 = vpop.eup %1469  ;;  %v925_v2 = vsel %vm497_vm1, %v851_v27, 0.0  ;;  %v855_v41 = vmul.f32 %v1468_v29, %v2068_v56  ;;  %1489 = vtanh.f32 %v2006_v35 }
 0x1a8   :  { %v1472_v0 = vpop.eup %1471  ;;  %v865_v42 = vsel %vm497_vm1, %v831_v31, 0.0  ;;  %v848_v32 = vmul.f32 %v1470_v33, %v2068_v56  ;;  %1491 = vtanh.f32 %v2015_v40 }
 0x1a9   :  { %920 = vadd.xlane.f32.xlu1 %v919_v26  ;;  %v1474_v43 = vpop.eup %1473  ;;  %v937_v62 = vsel %vm497_vm1, %v855_v41, 0.0  ;;  %v832_v48 = vmul.f32 %v1472_v0, %v2068_v56  ;;  %1493 = vtanh.f32 %v2012_v39 }
 0x1aa   :  { %v1476_v60 = vpop.eup %1475  ;;  %v916_v49 = vsel %vm497_vm1, %v848_v32, 0.0  ;;  %v850_v6 = vmul.f32 %v1474_v43, %v2068_v56  ;;  %1495 = vtanh.f32 %v2019_v52 }
 0x1ab   :  { %863 = vadd.xlane.f32.xlu0 %v862_v30  ;;  %v1478_v50 = vpop.eup %1477  ;;  %v868_v4 = vsel %vm497_vm1, %v832_v48, 0.0  ;;  %v833_v14 = vmul.f32 %v1476_v60, %v2068_v56  ;;  %1497 = vtanh.f32 %v2017_v54 }
 0x1ac   :  { %v1480_v12 = vpop.eup %1479  ;;  %v922_v55 = vsel %vm497_vm1, %v850_v6, 0.0  ;;  %v854_v36 = vmul.f32 %v1478_v50, %v2068_v56  ;;  %1499 = vtanh.f32 %v2033_v38 }
 0x1ad   :  { %926 = vadd.xlane.f32.xlu1 %v925_v2  ;;  %v1482_v53 = vpop.eup %1481  ;;  %v871_v63 = vsel %vm497_vm1, %v833_v14, 0.0  ;;  %v835_v61 = vmul.f32 %v1480_v12, %v2068_v56  ;;  %1501 = vtanh.f32 %v2030_v46 }
 0x1ae   :  { %v1484_v45 = vpop.eup %1483  ;;  %v934_v35 = vsel %vm497_vm1, %v854_v36, 0.0  ;;  %v834_v40 = vmul.f32 %v1482_v53, %v2068_v56  ;;  %1503 = vtanh.f32 %v2059_v23  ;;  %v995_v53 = vld [vmem:[#allocation8 + $0x8] sm:$0xff] }
 0x1af   :  { %866 = vadd.xlane.f32.xlu0 %v865_v42  ;;  %v1486_v1 = vpop.eup %1485  ;;  %v877_v51 = vsel %vm497_vm1, %v835_v61, 0.0  ;;  %v839_v5 = vmul.f32 %v1484_v45, %v2068_v56  ;;  %1505 = vtanh.f32 %v2056_v9 }
 0x1b0   :  { %v1488_v21 = vpop.eup %1487  ;;  %v874_v39 = vsel %vm497_vm1, %v834_v40, 0.0  ;;  %v838_v52 = vmul.f32 %v1486_v1, %v2068_v56  ;;  %1507 = vtanh.f32 %v2043_v57 }
 0x1b1   :  { %938 = vadd.xlane.f32.xlu1 %v937_v62  ;;  %v1490_v8 = vpop.eup %1489  ;;  %v889_v19 = vsel %vm497_vm1, %v839_v5, 0.0  ;;  %v853_v18 = vmul.f32 %v1488_v21, %v2068_v56  ;;  %1509 = vtanh.f32 %v2040_v59 }
 0x1b2   :  { %v1492_v58 = vpop.eup %1491  ;;  %v886_v54 = vsel %vm497_vm1, %v838_v52, 0.0  ;;  %v852_v38 = vmul.f32 %v1490_v8, %v2068_v56  ;;  %1511 = vtanh.f32 %v2047_v3 }
 0x1b3   :  { %917 = vadd.xlane.f32.xlu0 %v916_v49  ;;  %v1494_v13 = vpop.eup %1493  ;;  %v931_v15 = vsel %vm497_vm1, %v853_v18, 0.0  ;;  %v857_v34 = vmul.f32 %v1492_v58, %v2068_v56  ;;  %1513 = vtanh.f32 %v2050_v7 }
 0x1b4   :  { %v1496_v25 = vpop.eup %1495  ;;  %v928_v46 = vsel %vm497_vm1, %v852_v38, 0.0  ;;  %v856_v23 = vmul.f32 %v1494_v13, %v2068_v56  ;;  %1515 = vtanh.f32 %v2063_v47  ;;  %v2158_v38 = vand.u32 127, %v585_v11 }
 0x1b5   :  { %869 = vadd.xlane.f32.xlu1 %v868_v4  ;;  %v1498_v28 = vpop.eup %1497  ;;  %v943_v37 = vsel %vm497_vm1, %v857_v34, 0.0  ;;  %v859_v44 = vmul.f32 %v1496_v25, %v2068_v56  ;;  %1517 = vtanh.f32 %v2066_v20 }
 0x1b6   :  { %v1500_v10 = vpop.eup %1499  ;;  %v940_v16 = vsel %vm497_vm1, %v856_v23, 0.0  ;;  %v858_v9 = vmul.f32 %v1498_v28, %v2068_v56  ;;  %v1040_v34 = vadd.s32 4294967288, %v2158_v38  ;;  %v2172_v11 = vsub.s32 %v2158_v38, %v1967_v17 }
 0x1b7   :  { %923 = vadd.xlane.f32.xlu0 %v922_v55  ;;  %v1502_v57 = vpop.eup %1501  ;;  %v949_v22 = vsel %vm497_vm1, %v859_v44, 0.0  ;;  %v837_v24 = vmul.f32 %v1500_v10, %v2068_v56 }
 0x1b8   :  { %v1504_v26 = vpop.eup %1503  ;;  %v946_v59 = vsel %vm497_vm1, %v858_v9, 0.0  ;;  %v836_v27 = vmul.f32 %v1502_v57, %v2068_v56  ;;  %v2167_v28 = vsub.s32 %v1040_v34, %v1967_v17 }
 0x1b9   :  { %872 = vadd.xlane.f32.xlu1 %v871_v63  ;;  %v1506_v29 = vpop.eup %1505  ;;  %v883_v3 = vsel %vm497_vm1, %v837_v24, 0.0  ;;  %v841_v30 = vmul.f32 %v1504_v26, %v2068_v56  ;;  %v994_v63 = vld [vmem:[#allocation8] sm:$0xff] }
 0x1ba   :  { %v1508_v31 = vpop.eup %1507  ;;  %v880_v33 = vsel %vm497_vm1, %v836_v27, 0.0  ;;  %v840_v7 = vmul.f32 %v1506_v29, %v2068_v56 }
 0x1bb   :  { %935 = vadd.xlane.f32.xlu0 %v934_v35  ;;  %v1510_v2 = vpop.eup %1509  ;;  %v895_v47 = vsel %vm497_vm1, %v841_v30, 0.0  ;;  %v843_v41 = vmul.f32 %v1508_v31, %v2068_v56 }
 0x1bc   :  { %v1512_v0 = vpop.eup %1511  ;;  %v892_v42 = vsel %vm497_vm1, %v840_v7, 0.0  ;;  %v842_v32 = vmul.f32 %v1510_v2, %v2068_v56 }
 0x1bd   :  { %878 = vadd.xlane.f32.xlu1 %v877_v51  ;;  %v1514_v43 = vpop.eup %1513  ;;  %v901_v20 = vsel %vm497_vm1, %v843_v41, 0.0  ;;  %v861_v62 = vmul.f32 %v1512_v0, %v2068_v56 }
 0x1be   :  { %v1516_v48 = vpop.eup %1515  ;;  %v898_v60 = vsel %vm497_vm1, %v842_v32, 0.0  ;;  %v860_v49 = vmul.f32 %v1514_v43, %v2068_v56 }
 0x1bf   :  { %875 = vadd.xlane.f32.xlu0 %v874_v39  ;;  %v1518_v6 = vpop.eup %1517  ;;  %v955_v50 = vsel %vm497_vm1, %v861_v62, 0.0  ;;  %v845_v4 = vmul.f32 %v1516_v48, %v2068_v56 }
 0x1c0   :  { %v952_v14 = vsel %vm497_vm1, %v860_v49, 0.0  ;;  %v844_v12 = vmul.f32 %v1518_v6, %v2068_v56 }
 0x1c1   :  { %890 = vadd.xlane.f32.xlu1 %v889_v19  ;;  %v907_v55 = vsel %vm497_vm1, %v845_v4, 0.0 }
 0x1c2   :  { %v904_v36 = vsel %vm497_vm1, %v844_v12, 0.0 }
 0x1c3   :  { %887 = vadd.xlane.f32.xlu0 %v886_v54 }
 0x1c5   :  { %932 = vadd.xlane.f32.xlu1 %v931_v15 }
 0x1c7   :  { %929 = vadd.xlane.f32.xlu0 %v928_v46  ;;  %v2164_v46 = vstv %s2299_s7  ;;  %s1724_s7 = smov [#allocation15]  }
 0x1c8   :  { %s1237_s12 = sshll.u32 %s1724_s7, 4  ;;  %s1238_s12 = int_to_ptr.vmem [resolvable:$true] %s1237_s12 }
 0x1c9   :  { %944 = vadd.xlane.f32.xlu1 %v943_v37  ;;  %s1681_s23 = scalar_lea.vmem %s1238_s12, 256  ;;  %p1686_p1 = scmp.lt.s32.totalorder %s1238_s12, %s1238_s12 }
 0x1ca   :  { %p1682_p0 = scmp.ne.s32.totalorder %s1238_s12, %s1681_s23  ;;  %p1687_p2 = scmp.lt.s32.totalorder %s1681_s23, %s1681_s23 }
 0x1cb   :  { %941 = vadd.xlane.f32.xlu0 %v940_v16 }
 0x1cc   :  { %p1688_p3 = por %p1687_p2, %p1686_p1 }
 0x1cd   :  { %950 = vadd.xlane.f32.xlu1 %v949_v22 }
 0x1ce   :  { %p1689_p4 = pnand %p1688_p3, %p1682_p0 }
 0x1cf   :  { %947 = vadd.xlane.f32.xlu0 %v946_v59 }
 0x1d1   :  { %884 = vadd.xlane.f32.xlu1 %v883_v3 }
 0x1d3   :  { %881 = vadd.xlane.f32.xlu0 %v880_v33 }
 0x1d5   :  { %896 = vadd.xlane.f32.xlu1 %v895_v47 }
 0x1d7   :  { %893 = vadd.xlane.f32.xlu0 %v892_v42 }
 0x1d9   :  { %902 = vadd.xlane.f32.xlu1 %v901_v20 }
 0x1db   :  { %899 = vadd.xlane.f32.xlu0 %v898_v60 }
 0x1dd   :  { %956 = vadd.xlane.f32.xlu1 %v955_v50 }
 0x1df   :  { %953 = vadd.xlane.f32.xlu0 %v952_v14 }
 0x1e1   :  { %908 = vadd.xlane.f32.xlu1 %v907_v55 }
 0x1e3   :  { %905 = vadd.xlane.f32.xlu0 %v904_v36 }
 0x1f2   :  { %1000 = vperm.xlu1 %1454, %v995_v53  }
 0x1f9   :  { %997 = vperm.xlu0 %1453, %v994_v63  }
 0x232   :  { %v915_v61 = vpop.xlane.xlu1 %914 }
 0x233   :  { %v977_v37 = vadd.f32 %v2164_v46, %v915_v61 }
 0x234   :  { %v912_v45 = vpop.xlane.xlu0 %911 }
 0x235   :  { %v976_v44 = vadd.f32 %v2164_v46, %v912_v45  ;;  %v1117_v22 = vrot.slane %v977_v37, %v2167_v28 }
 0x236   :  { %v921_v35 = vpop.xlane.xlu1 %920 }
 0x237   :  { %v979_v9 = vadd.f32 %v2164_v46, %v921_v35  ;;  %v1113_v24 = vrot.slane %v976_v44, %v2172_v11 }
 0x238   :  { %v864_v40 = vpop.xlane.xlu0 %863 }
 0x239   :  { %v960_v59 = vadd.f32 %v2164_v46, %v864_v40  ;;  %v1126_v3 = vrot.slane %v979_v9, %v2167_v28  ;;  %v1118_v7 = vsel %vm1045_vm2, %v1117_v22, %v1113_v24 }
 0x23a   :  { %v927_v1 = vpop.xlane.xlu1 %926 }
 0x23b   :  { %v981_v17 = vadd.f32 %v2164_v46, %v927_v1  ;;  %v1039_v42 = vrot.slane %v960_v59, %v2172_v11 }
 0x23c   :  { %v867_v51 = vpop.xlane.xlu0 %866 }
 0x23d   :  { %v961_v2 = vadd.f32 %v2164_v46, %v867_v51  ;;  %v1135_v62 = vrot.slane %v981_v17, %v2167_v28 }
 0x23e   :  { %v939_v5 = vpop.xlane.xlu1 %938 }
 0x23f   :  { %v985_v47 = vadd.f32 %v2164_v46, %v939_v5  ;;  %v1044_v55 = vrot.slane %v961_v2, %v2167_v28 }
 0x240   :  { %v918_v21 = vpop.xlane.xlu0 %917 }
 0x241   :  { %v978_v16 = vadd.f32 %v2164_v46, %v918_v21  ;;  %v1153_v36 = vrot.slane %v985_v47, %v2167_v28 }
 0x242   :  { %v870_v56 = vpop.xlane.xlu1 %869 }
 0x243   :  { %v1122_v29 = vrot.slane %v978_v16, %v2172_v11  ;;  %v962_v32 = vadd.f32 %v2164_v46, %v870_v56 }
 0x244   :  { %v924_v39 = vpop.xlane.xlu0 %923 }
 0x245   :  { %v980_v27 = vadd.f32 %v2164_v46, %v924_v39  ;;  %v1127_v48 = vsel %vm1045_vm2, %v1126_v3, %v1122_v29  ;;  %v1050_v45 = vrot.slane %v962_v32, %v2172_v11 }
 0x246   :  { %v873_v52 = vpop.xlane.xlu1 %872  ;;  %v1196_v51 = vsel %vm1182_vm3, %v1127_v48, %v1118_v7 }
 0x247   :  { %v963_v41 = vadd.f32 %v2164_v46, %v873_v52  ;;  %v1131_v43 = vrot.slane %v980_v27, %v2172_v11 }
 0x248   :  { %v936_v8 = vpop.xlane.xlu0 %935 }
 0x249   :  { %v984_v20 = vadd.f32 %v2164_v46, %v936_v8  ;;  %v1054_v53 = vrot.slane %v963_v41, %v2167_v28  ;;  %v1136_v35 = vsel %vm1045_vm2, %v1135_v62, %v1131_v43 }
 0x24a   :  { %v879_v19 = vpop.xlane.xlu1 %878 }
 0x24b   :  { %v965_v63 = vadd.f32 %v2164_v46, %v879_v19  ;;  %v1149_v40 = vrot.slane %v984_v20, %v2172_v11  ;;  %v1055_v34 = vsel %vm1045_vm2, %v1054_v53, %v1050_v45 }
 0x24c   :  { %v876_v18 = vpop.xlane.xlu0 %875 }
 0x24d   :  { %v964_v1 = vadd.f32 %v2164_v46, %v876_v18  ;;  %v1046_v18 = vsel %vm1045_vm2, %v1044_v55, %v1039_v42  ;;  %v1154_v37 = vsel %vm1045_vm2, %v1153_v36, %v1149_v40 }
 0x24e   :  { %v2153_v58 = vpop.xlane.xlu1 %890 }
 0x24f   :  { %v1059_v44 = vrot.slane %v964_v1, %v2172_v11 }
 0x250   :  { %v2155_v54 = vpop.xlane.xlu0 %887 }
 0x251   :  { %v968_v9 = vadd.f32 %v2164_v46, %v2155_v54 }
 0x252   :  { %v933_v13 = vpop.xlane.xlu1 %932 }
 0x253   :  { %v983_v30 = vadd.f32 %v2164_v46, %v933_v13 }
 0x254   :  { %v930_v15 = vpop.xlane.xlu0 %929 }
 0x255   :  { %v982_v31 = vadd.f32 %v2164_v46, %v930_v15  ;;  %v1144_v6 = vrot.slane %v983_v30, %v2167_v28  ;;  %v1197_v15 = vsel %vm1184_vm4, %v1136_v35, %v1196_v51 }
 0x256   :  { %v945_v25 = vpop.xlane.xlu1 %944 }
 0x257   :  { %v987_v60 = vadd.f32 %v2164_v46, %v945_v25  ;;  %v1140_v50 = vrot.slane %v982_v31, %v2172_v11  ;;  %v1063_v25 = vrot.slane %v965_v63, %v2167_v28 }
 0x258   :  { %v942_v23 = vpop.xlane.xlu0 %941 }
 0x259   :  { %v986_v49 = vadd.f32 %v2164_v46, %v942_v23  ;;  %v1162_v5 = vrot.slane %v987_v60, %v2167_v28  ;;  %v1145_v39 = vsel %vm1045_vm2, %v1144_v6, %v1140_v50  ;;  %v1064_v41 = vsel %vm1045_vm2, %v1063_v25, %v1059_v44 }
 0x25a   :  { %v951_v10 = vpop.xlane.xlu1 %950 }
 0x25b   :  { %v989_v4 = vadd.f32 %v2164_v46, %v951_v10  ;;  %v1158_v21 = vrot.slane %v986_v49, %v2172_v11  ;;  %v969_v10 = vadd.f32 %v2164_v46, %v2153_v58 }
 0x25c   :  { %v948_v57 = vpop.xlane.xlu0 %947 }
 0x25d   :  { %v988_v14 = vadd.f32 %v2164_v46, %v948_v57  ;;  %v1171_v52 = vrot.slane %v989_v4, %v2167_v28  ;;  %v1198_v57 = vsel %vm1186_vm5, %v1145_v39, %v1197_v15  ;;  %v1163_v22 = vsel %vm1045_vm2, %v1162_v5, %v1158_v21 }
 0x25e   :  { %v885_v26 = vpop.xlane.xlu1 %884  ;;  %v1081_v7 = vrot.slane %v969_v10, %v2167_v28  ;;  %v1199_v47 = vsel %vm1188_vm6, %v1154_v37, %v1198_v57 }
 0x25f   :  { %v967_v56 = vadd.f32 %v2164_v46, %v885_v26  ;;  %v1167_v8 = vrot.slane %v988_v14, %v2172_v11  ;;  %v1200_v32 = vsel %vm1190_vm7, %v1163_v22, %v1199_v47 }
 0x260   :  { %v882_v33 = vpop.xlane.xlu0 %881 }
 0x261   :  { %v966_v19 = vadd.f32 %v2164_v46, %v882_v33  ;;  %v1072_v24 = vrot.slane %v967_v56, %v2167_v28  ;;  %v1172_v58 = vsel %vm1045_vm2, %v1171_v52, %v1167_v8  ;;  %v1183_v33 = vsel %vm1182_vm3, %v1055_v34, %v1046_v18 }
 0x262   :  { %v897_v0 = vpop.xlane.xlu1 %896  ;;  %v1201_v60 = vsel %vm1192_vm8, %v1172_v58, %v1200_v32 }
 0x263   :  { %v1068_v26 = vrot.slane %v966_v19, %v2172_v11  ;;  %v971_v59 = vadd.f32 %v2164_v46, %v897_v0  ;;  %v1077_v0 = vrot.slane %v968_v9, %v2172_v11 }
 0x264   :  { %v894_v12 = vpop.xlane.xlu0 %893 }
 0x265   :  { %v970_v27 = vadd.f32 %v2164_v46, %v894_v12  ;;  %v1073_v43 = vsel %vm1045_vm2, %v1072_v24, %v1068_v26  ;;  %v1090_v20 = vrot.slane %v971_v59, %v2167_v28  ;;  %v1185_v12 = vsel %vm1184_vm4, %v1064_v41, %v1183_v33 }
 0x266   :  { %v903_v61 = vpop.xlane.xlu1 %902  ;;  %v1187_v53 = vsel %vm1186_vm5, %v1073_v43, %v1185_v12  ;;  %v1082_v35 = vsel %vm1045_vm2, %v1081_v7, %v1077_v0 }
 0x267   :  { %v973_v29 = vadd.f32 %v2164_v46, %v903_v61  ;;  %v1086_v62 = vrot.slane %v970_v27, %v2172_v11  ;;  %v1189_v1 = vsel %vm1188_vm6, %v1082_v35, %v1187_v53 }
 0x268   :  { %v900_v13 = vpop.xlane.xlu0 %899 }
 0x269   :  { %v972_v3 = vadd.f32 %v2164_v46, %v900_v13  ;;  %v1099_v49 = vrot.slane %v973_v29, %v2167_v28  ;;  %v1091_v45 = vsel %vm1045_vm2, %v1090_v20, %v1086_v62 }
 0x26a   :  { %v957_v23 = vpop.xlane.xlu1 %956  ;;  %v1191_v51 = vsel %vm1190_vm7, %v1091_v45, %v1189_v1 }
 0x26b   :  { %v991_v16 = vadd.f32 %v2164_v46, %v957_v23  ;;  %v1095_v6 = vrot.slane %v972_v3, %v2172_v11 }
 0x26c   :  { %v954_v17 = vpop.xlane.xlu0 %953 }
 0x26d   :  { %v1180_v54 = vrot.slane %v991_v16, %v2167_v28  ;;  %v990_v30 = vadd.f32 %v2164_v46, %v954_v17  ;;  %v1100_v40 = vsel %vm1045_vm2, %v1099_v49, %v1095_v6 }
 0x26e   :  { %v909_v31 = vpop.xlane.xlu1 %908  ;;  %v1193_v21 = vsel %vm1192_vm8, %v1100_v40, %v1191_v51 }
 0x26f   :  { %v975_v2 = vadd.f32 %v2164_v46, %v909_v31  ;;  %v1176_v42 = vrot.slane %v990_v30, %v2172_v11 }
 0x270   :  { %v906_v48 = vpop.xlane.xlu0 %905 }
 0x271   :  { %v974_v50 = vadd.f32 %v2164_v46, %v906_v48  ;;  %v1181_v14 = vsel %vm1045_vm2, %v1180_v54, %v1176_v42  ;;  %v1108_v55 = vrot.slane %v975_v2, %v2167_v28 }
 0x272   :  { %v1001_v4 = vpop.permute.xlu1 %1000  ;;  %v1202_v36 = vsel %vm1194_vm9, %v1181_v14, %v1201_v60 }
 0x273   :  { %vm1003_vm11 = vcmp.ge.s32.totalorder %v2158_v38, %v1001_v4  ;;  %v1104_v63 = vrot.slane %v974_v50, %v2172_v11 }
 0x274   :  { %v1206_v61 = vsel %vm1003_vm11, -1e+30, %v1202_v36 }
 0x275   :  { %v1211_v46 = vsel %vm1207_vm10, %v1206_v61, -inf  ;;  %v1109_v28 = vsel %vm1045_vm2, %v1108_v55, %v1104_v63 }
 0x276   :  { %1212 = vmax.xlane.f32.xlu0 %v1211_v46  ;;  %v1195_v11 = vsel %vm1194_vm9, %v1109_v28, %v1193_v21 }
 0x278   :  { %v998_v5 = vpop.permute.xlu0 %997 }
 0x279   :  { %vm1002_vm12 = vcmp.ge.s32.totalorder %v2158_v38, %v998_v5 }
 0x27a   :  { %v1205_v56 = vsel %vm1002_vm12, -1e+30, %v1195_v11 }
 0x27b   :  { %v1208_v39 = vsel %vm1207_vm10, %v1205_v56, -inf }
 0x27c   :  { %1209 = vmax.xlane.f32.xlu1 %v1208_v39 }
 0x303   :  { %v1213_v52 = vpop.xlane.xlu0 %1212 }
 0x304   :  { %v1215_v8 = vsub.f32 %v1206_v61, %v1213_v52 }
 0x306   :  { %v1218_v18 = vmul.f32 1.442695, %v1215_v8 }
 0x309   :  { %v1210_v19 = vpop.xlane.xlu1 %1209 }
 0x30a   :  { %v1214_v13 = vsub.f32 %v1205_v56, %v1210_v19 }
 0x30c   :  { %v1216_v15 = vmul.f32 1.442695, %v1214_v13 }
 0x30e   :  { %1519 = vpow2.f32 %v1216_v15 }
 0x30f   :  { %1521 = vpow2.f32 %v1218_v18 }
 0x318   :  { %v1520_v34 = vpop.eup %1519 }
 0x319   :  { %v1220_v25 = vsel %vm1207_vm10, %v1520_v34, 0.0  ;;  %v1522_v23 = vpop.eup %1521 }
 0x31a   :  { %1221 = vadd.xlane.f32.xlu1 %v1220_v25  ;;  %v1223_v38 = vsel %vm1207_vm10, %v1522_v23, 0.0 }
 0x31e   :  { %1224 = vadd.xlane.f32.xlu1 %v1223_v38 }
 0x3a7   :  { %v1222_v37 = vpop.xlane.xlu1 %1221 }
 0x3a8   :  { %1523 = vrcp.f32 %v1222_v37 }
 0x3ab   :  { %v1225_v44 = vpop.xlane.xlu1 %1224 }
 0x3ac   :  { %1525 = vrcp.f32 %v1225_v44 }
 0x3b2   :  { %v1524_v10 = vpop.eup %1523 }
 0x3b3   :  { %v1228_v16 = vmul.f32 %v1524_v10, %v1520_v34 }
 0x3b5   :  { %1230 = vst.msk [vmem:[#allocation15] sm:$0xff] %vm1207_vm10, %v1228_v16 }
 0x3b6   :  { %v1526_v9 = vpop.eup %1525 }
 0x3b7   :  { %v1229_v57 = vmul.f32 %v1526_v9, %v1522_v23 }
 0x3b9   :  { %1231 = vst.msk [vmem:[#allocation15 + $0x8] sm:$0xff] %vm1207_vm10, %v1229_v57 }
 0x3ba   :  { %1692 = shalt.err (!%p1689_p4)
}
 0x3bb   :  { %s1693_s26 = scalar_lea.hbm %s2300_s8, 256 }
 0x3bc   :  { %p1694_p5 = scmp.ne.s32.totalorder %s2300_s8, %s1693_s26  ;;  %p1697_p6 = scmp.lt.u32.totalorder %s1693_s26, %s2300_s8 }
 0x3be   :  { %p1699_p7 = pnand %p1697_p6, %p1694_p5 }
 0x3c0   :  { %1702 = shalt.err (!%p1699_p7)
}
 0x3c1   :  { %1243 = dma.vmem_to_hbm [thread:$0]  %s1238_s12, 256, %s2300_s8, [#allocation5], %s1715_s17, %s1715_s17, %s1716_s18  }
 0x3c2   :  { %1711 = dma.done.wait [#allocation5], 256  }
 0x3c3   :  { %1712 = vsyncadd [#allocation5], 4294967040 }
 0x3c4   :  { %1247 = vsyncpa [#allocation4], 1 }
 0x3c5   :  { %1248 = vsyncpa [#allocation7], 1 }
 0x3c6   :  { %1249 = vsyncpa [#allocation10], 1 }
 0x3c7   :  { %1250 = vsyncpa [#allocation13], 1 }
 0x3c8   :  { %1251 = vsyncpa [#allocation5], 1 }

</bundles_post_ra>
